<compile_context>
chip_gen: v7x
topology: tpu7x:2x2x1
jax: 0.10.0
libtpu: 0.0.40
codegen_flags: <defaults>
</compile_context>

<pallas_src>
import math
import functools

import jax
import jax.numpy as jnp
from jax.experimental import pallas as pl
from jax.experimental.pallas import tpu as pltpu


# ----------------------------- in-kernel helpers -----------------------------

def _layer_norm_padded(x, gamma, beta, true_dim, eps=1e-5):
    """PyTorch nn.LayerNorm over the last dim where x may be zero-padded past
    `true_dim` lanes.  Padded lanes of x / gamma / beta are exactly zero, so
    only the variance needs a correction term (padded diff == -mean)."""
    hp = x.shape[-1]
    inv_n = 1.0 / true_dim
    mean = jnp.sum(x, axis=-1, keepdims=True) * inv_n
    diff = x - mean
    ssq = jnp.sum(diff * diff, axis=-1, keepdims=True)
    pad = hp - true_dim                      # static python int
    if pad:
        ssq = ssq - pad * (mean * mean)
    inv = jax.lax.rsqrt(ssq * inv_n + eps)
    # gamma/beta are zero on padded lanes -> padded lanes stay exactly zero.
    return diff * inv * gamma + beta


def _gelu_exact(x):
    # PyTorch nn.GELU() default: exact erf formulation.
    return 0.5 * x * (1.0 + jax.lax.erf(x * (1.0 / math.sqrt(2.0))))


def _layer_norm(x, gamma, beta, eps=1e-5):
    mean = jnp.mean(x, axis=-1, keepdims=True)
    var = jnp.mean(jnp.square(x - mean), axis=-1, keepdims=True)
    return (x - mean) * jax.lax.rsqrt(var + eps) * gamma + beta


# --------------------------------- kernel -------------------------------------

def dynamics_mlp_kernel(x_ref, act_ref,
                        w1_ref, g1_ref, be1_ref,
                        w2_ref, b2_ref, g2_ref, be2_ref,
                        w3_ref, b3_ref,
                        o_ref, *, true_h):
    bt, tn, d = x_ref.shape                   # batch-fold, token tile, state dim
    hp = w1_ref.shape[1]
    rows = bt * tn                            # MXU M dimension for this step

    x = x_ref[...].reshape(rows, d)

    # Layer 1: state part of Linear(D+A, H) on the MXU (bf16 operands, f32
    # accumulate) + per-batch (action @ W1_action + b1) precomputed outside.
    h = jnp.dot(x.astype(jnp.bfloat16), w1_ref[...],
                preferred_element_type=jnp.float32)                 # [rows, Hp]
    h = (h.reshape(bt, tn, hp) + act_ref[...]).reshape(rows, hp)
    h = _layer_norm_padded(h, g1_ref[...], be1_ref[...], true_h)
    h = _gelu_exact(h)

    # Layer 2: Linear(H, H) -> LayerNorm -> GELU.
    h = jnp.dot(h.astype(jnp.bfloat16), w2_ref[...],
                preferred_element_type=jnp.float32) + b2_ref[...]
    h = _layer_norm_padded(h, g2_ref[...], be2_ref[...], true_h)
    h = _gelu_exact(h)

    # Output projection Linear(H, D): written at the true D (no padded store).
    out = jnp.dot(h.astype(jnp.bfloat16), w3_ref[...],
                  preferred_element_type=jnp.float32) + b3_ref[...]
    o_ref[...] = out.reshape(bt, tn, d).astype(o_ref.dtype)


# --------------------------------- wrapper ------------------------------------

def _round_up(v, m):
    return (v + m - 1) // m * m


def _pad_to(x, target, axis):
    pad = target - x.shape[axis]
    if pad == 0:
        return x
    widths = [(0, 0)] * x.ndim
    widths[axis] = (0, pad)
    return jnp.pad(x, widths)


def _vmem_budget(weight_bytes):
    """Generation-aware VMEM limit and tile budget (bytes)."""
    try:
        vmem_cap = int(pltpu.get_tpu_info().vmem_capacity_bytes)
    except Exception:
        vmem_cap = 64 << 20                   # conservative (v7x per-core VMEM)
    vmem_limit = min(vmem_cap * 3 // 4, 96 << 20)
    # Grid-resident weights must always fit (worst case: double-buffered).
    vmem_limit = min(max(vmem_limit, 2 * weight_bytes + (8 << 20)),
                     vmem_cap * 15 // 16)
    tile_budget = max(vmem_limit * 2 // 3, 1 << 20)
    return vmem_limit, tile_budget


def _select_tiles(B, N, D, Hp, weight_bytes, tile_budget):
    """Pick (batch-fold bt, token tile tn) from the VMEM budget.  Folds batch
    elements when N is small so the MXU M dim is filled and the ~0.35us/step
    grid overhead is amortized."""
    avail = max(tile_budget - 2 * weight_bytes, 1 << 20)
    # Per row: 2x-buffered f32 state + output tiles (4*D each, twice), ~3 live
    # f32 [*, Hp] intermediates and one bf16 [*, Hp] matmul operand copy.
    per_row = 16 * D + 14 * Hp
    rows_cap = int(avail // per_row)
    rows_cap = max(8, min(rows_cap, 2048))
    rows_cap -= rows_cap % 8

    if N <= rows_cap:
        tn = N
        bt = 1
        if N % 8 == 0 and B > 1:              # batch folding needs N % 8 == 0
            bt = max(1, min(B, rows_cap // N))
        if bt >= B and B >= 2:                # keep >= 2 grid steps (2-TC chips)
            bt = (B + 1) // 2
        if B * (-(-N // tn)) < 2 and tn % 16 == 0 and tn >= 16:
            tn //= 2                          # give the second core some work
    else:
        bt = 1
        tn = rows_cap
    return bt, tn


def dynamics_model_forward(state, action, params):
    """state: [B, N, D] f32, action: [B, A] f32 -> [B, N, D] f32."""
    B, N, D = state.shape
    H = params["w1"].shape[1]
    Hp = _round_up(H, 128)                    # lane-dense hidden width

    # --- tiny glue in plain JAX (no [M, D+A] concat round trip) --------------
    # Split the first Linear: action contribution (+ b1) is a small [B, H] vec.
    w1_state = params["w1"][:D]
    w1_act = params["w1"][D:]
    act_proj = action @ w1_act + params["b1"]                      # [B, H] f32
    act_p = _pad_to(act_proj, Hp, 1).reshape(B, 1, Hp)

    # Zero-pad the hidden width to a lane-dense multiple of 128.  Padded lanes
    # stay exactly zero end-to-end (zero weight rows/cols, zero gamma/beta/
    # bias) and LayerNorm stats are corrected to the true H.  Weight matrices
    # are stored bf16 (MXU-native, half the HBM/VMEM bytes); LN/bias stay f32.
    w1p = _pad_to(w1_state, Hp, 1).astype(jnp.bfloat16)            # [D,  Hp]
    g1p = _pad_to(params["g1"], Hp, 1)
    be1p = _pad_to(params["be1"], Hp, 1)
    w2p = _pad_to(_pad_to(params["w2"], Hp, 0), Hp, 1).astype(jnp.bfloat16)
    b2p = _pad_to(params["b2"], Hp, 1)
    g2p = _pad_to(params["g2"], Hp, 1)
    be2p = _pad_to(params["be2"], Hp, 1)
    w3p = _pad_to(params["w3"], Hp, 0).astype(jnp.bfloat16)        # [Hp, D]
    b3 = params["b3"]                                              # [1,  D]

    weight_bytes = (2 * (D * Hp + Hp * Hp + Hp * D)                # bf16 matrices
                    + 4 * (5 * Hp + D))                            # f32 LN / bias
    vmem_limit, tile_budget = _vmem_budget(weight_bytes)
    bt, tn = _select_tiles(B, N, D, Hp, weight_bytes, tile_budget)
    grid = (pl.cdiv(B, bt), pl.cdiv(N, tn))

    M = B * N
    cost = pl.CostEstimate(
        flops=2 * M * (D * Hp + Hp * Hp + Hp * D),
        transcendentals=2 * M * Hp,                                # erf x2
        bytes_accessed=8 * M * D + 4 * B * Hp + weight_bytes,
    )

    kernel = functools.partial(dynamics_mlp_kernel, true_h=H)
    operands = (state, act_p, w1p, g1p, be1p, w2p, b2p, g2p, be2p, w3p, b3)

    def _call(single_buffer_weights):
        def const_spec(shape):
            idx = lambda b, j: (0,) * len(shape)
            if single_buffer_weights:
                # Constant index_map -> the second pipeline buffer is pure
                # VMEM waste; request a single buffer.
                return pl.BlockSpec(shape, idx, pipeline_mode=pl.Buffered(1))
            return pl.BlockSpec(shape, idx)

        grid_spec = pl.GridSpec(
            grid=grid,
            in_specs=[
                pl.BlockSpec((bt, tn, D), lambda b, j: (b, j, 0)),  # state tile
                pl.BlockSpec((bt, 1, Hp), lambda b, j: (b, 0, 0)),  # action proj
                const_spec((D, Hp)),                                # w1 (state part)
                const_spec((1, Hp)), const_spec((1, Hp)),           # ln1 gamma/beta
                const_spec((Hp, Hp)), const_spec((1, Hp)),          # w2, b2
                const_spec((1, Hp)), const_spec((1, Hp)),           # ln2 gamma/beta
                const_spec((Hp, D)), const_spec((1, D)),            # w3, b3
            ],
            out_specs=pl.BlockSpec((bt, tn, D), lambda b, j: (b, j, 0)),
        )
        return pl.pallas_call(
            kernel,
            out_shape=jax.ShapeDtypeStruct((B, N, D), state.dtype),
            grid_spec=grid_spec,
            compiler_params=pltpu.CompilerParams(
                dimension_semantics=("parallel", "parallel"),
                vmem_limit_bytes=int(vmem_limit)),
            cost_estimate=cost,
        )(*operands)

    try:
        return _call(True)
    except Exception:
        # pl.Buffered(1) not accepted by this jax/Mosaic version -> fall back
        # to default double-buffering for the constant blocks.
        return _call(False)


# ----------------------------- reference (JAX) --------------------------------

def dynamics_model_reference(state, action, params):
    B, N, D = state.shape
    A = action.shape[-1]
    action_expanded = jnp.broadcast_to(action[:, None, :], (B, N, A))
    x = jnp.concatenate([state, action_expanded], axis=-1).reshape(B * N, D + A)
    h = x @ params["w1"] + params["b1"]
    h = _layer_norm(h, params["g1"], params["be1"])
    h = _gelu_exact(h)
    h = h @ params["w2"] + params["b2"]
    h = _layer_norm(h, params["g2"], params["be2"])
    h = _gelu_exact(h)
    out = h @ params["w3"] + params["b3"]
    return out.reshape(B, N, D)


# ---------------------------------- main --------------------------------------

if __name__ == "__main__":
    # Small shapes consistent with the module's forward signature.
    B, N = 2, 8            # batch, tokens
    D, A, H = 32, 16, 32   # state_dim, action_dim, hidden_dim

    key = jax.random.PRNGKey(0)
    ks = jax.random.split(key, 12)

    # Deterministic synthetic parameters (shapes from DynamicsModel.__init__,
    # stored in x @ W convention).
    params = {
        "w1": jax.random.normal(ks[0], (D + A, H), jnp.float32) * 0.02,
        "b1": jax.random.normal(ks[3], (1, H), jnp.float32) * 0.02,
        "g1": 1.0 + 0.1 * jax.random.normal(ks[4], (1, H), jnp.float32),
        "be1": 0.05 * jax.random.normal(ks[5], (1, H), jnp.float32),
        "w2": jax.random.normal(ks[1], (H, H), jnp.float32) * 0.02,
        "b2": jax.random.normal(ks[6], (1, H), jnp.float32) * 0.02,
        "g2": 1.0 + 0.1 * jax.random.normal(ks[7], (1, H), jnp.float32),
        "be2": 0.05 * jax.random.normal(ks[8], (1, H), jnp.float32),
        "w3": jax.random.normal(ks[2], (H, D), jnp.float32) * 0.02,
        "b3": jax.random.normal(ks[9], (1, D), jnp.float32) * 0.02,
    }

    state = jax.random.normal(ks[10], (B, N, D), jnp.float32)
    action = jax.random.normal(ks[11], (B, A), jnp.float32)

    out = dynamics_model_forward(state, action, params)
    out = jax.block_until_ready(out)

    ref = dynamics_model_reference(state, action, params)
    assert out.shape == (B, N, D)
    # bf16 MXU operands (f32 accumulate, f32 LN/GELU) vs all-f32 reference.
    max_err = float(jnp.max(jnp.abs(out - ref)))
    assert max_err < 3e-2, f"mismatch vs reference: max_err={max_err}"

    # TODO(synk): transformer variant (nn.TransformerEncoder branch) not
    # implemented; only the default model_type='mlp' path is kernelized.
    print("KERNEL_OK")
</pallas_src>

<mosaic_0001>
module attributes {stable_mosaic.version = 11 : i64} {
  func.func @dynamics_mlp_kernel(%arg0: i32, %arg1: i32, %arg2: memref<1x8x32xf32, #tpu.memory_space<vmem>>, %arg3: memref<1x1x128xf32, #tpu.memory_space<vmem>>, %arg4: memref<32x128xbf16, #tpu.memory_space<vmem>>, %arg5: memref<1x128xf32, #tpu.memory_space<vmem>>, %arg6: memref<1x128xf32, #tpu.memory_space<vmem>>, %arg7: memref<128x128xbf16, #tpu.memory_space<vmem>>, %arg8: memref<1x128xf32, #tpu.memory_space<vmem>>, %arg9: memref<1x128xf32, #tpu.memory_space<vmem>>, %arg10: memref<1x128xf32, #tpu.memory_space<vmem>>, %arg11: memref<128x32xbf16, #tpu.memory_space<vmem>>, %arg12: memref<1x32xf32, #tpu.memory_space<vmem>>, %arg13: memref<1x8x32xf32, #tpu.memory_space<vmem>>) attributes {dimension_semantics = [#tpu.dimension_semantics<parallel>, #tpu.dimension_semantics<parallel>], iteration_bounds = array<i64: 2, 1>, scalar_prefetch = 0 : i64, scratch_operands = 0 : i64, tpu.core_type = #tpu.core_type<tc>, window_params = [{transform_indices = @transform_0, window_bounds = array<i64: 1, 8, 32>}, {transform_indices = @transform_1, window_bounds = array<i64: 1, 1, 128>}, {pipeline_mode = #tpu.pipeline_mode<synchronous>, transform_indices = @transform_2, window_bounds = array<i64: 32, 128>}, {pipeline_mode = #tpu.pipeline_mode<synchronous>, transform_indices = @transform_3, window_bounds = array<i64: 1, 128>}, {pipeline_mode = #tpu.pipeline_mode<synchronous>, transform_indices = @transform_4, window_bounds = array<i64: 1, 128>}, {pipeline_mode = #tpu.pipeline_mode<synchronous>, transform_indices = @transform_5, window_bounds = array<i64: 128, 128>}, {pipeline_mode = #tpu.pipeline_mode<synchronous>, transform_indices = @transform_6, window_bounds = array<i64: 1, 128>}, {pipeline_mode = #tpu.pipeline_mode<synchronous>, transform_indices = @transform_7, window_bounds = array<i64: 1, 128>}, {pipeline_mode = #tpu.pipeline_mode<synchronous>, transform_indices = @transform_8, window_bounds = array<i64: 1, 128>}, {pipeline_mode = #tpu.pipeline_mode<synchronous>, transform_indices = @transform_9, window_bounds = array<i64: 128, 32>}, {pipeline_mode = #tpu.pipeline_mode<synchronous>, transform_indices = @transform_10, window_bounds = array<i64: 1, 32>}, {transform_indices = @transform_11, window_bounds = array<i64: 1, 8, 32>}]} {
    %c0 = arith.constant 0 : index
    %c0_0 = arith.constant 0 : index
    %c0_1 = arith.constant 0 : index
    %0 = vector.load %arg2[%c0, %c0_0, %c0_1] : memref<1x8x32xf32, #tpu.memory_space<vmem>>, vector<1x8x32xf32>
    %1 = vector.shape_cast %0 : vector<1x8x32xf32> to vector<8x32xf32>
    %2 = arith.truncf %1 : vector<8x32xf32> to vector<8x32xbf16>
    %c0_2 = arith.constant 0 : index
    %c0_3 = arith.constant 0 : index
    %3 = vector.load %arg4[%c0_2, %c0_3] : memref<32x128xbf16, #tpu.memory_space<vmem>>, vector<32x128xbf16>
    %cst = arith.constant dense<0.000000e+00> : vector<8x128xf32>
    %4 = tpu.matmul %2, %3, %cst {dimension_numbers = #tpu.dot_dimension_numbers<[1], [0], [0], [1], [0, 0, 1, 1], [], []>} : vector<8x32xbf16>, vector<32x128xbf16>, vector<8x128xf32> -> vector<8x128xf32>
    %5 = vector.shape_cast %4 : vector<8x128xf32> to vector<1x8x128xf32>
    %c0_4 = arith.constant 0 : index
    %c0_5 = arith.constant 0 : index
    %c0_6 = arith.constant 0 : index
    %6 = vector.load %arg3[%c0_4, %c0_5, %c0_6] : memref<1x1x128xf32, #tpu.memory_space<vmem>>, vector<1x1x128xf32>
    %7 = vector.broadcast %6 : vector<1x1x128xf32> to vector<1x8x128xf32>
    %8 = arith.addf %5, %7 : vector<1x8x128xf32>
    %9 = vector.shape_cast %8 : vector<1x8x128xf32> to vector<8x128xf32>
    %c0_7 = arith.constant 0 : index
    %c0_8 = arith.constant 0 : index
    %10 = vector.load %arg5[%c0_7, %c0_8] : memref<1x128xf32, #tpu.memory_space<vmem>>, vector<1x128xf32>
    %c0_9 = arith.constant 0 : index
    %c0_10 = arith.constant 0 : index
    %11 = vector.load %arg6[%c0_9, %c0_10] : memref<1x128xf32, #tpu.memory_space<vmem>>, vector<1x128xf32>
    %cst_11 = arith.constant dense<0.000000e+00> : vector<8xf32>
    %12 = vector.multi_reduction <add>, %9, %cst_11 [1] : vector<8x128xf32> to vector<8xf32>
    %13 = vector.shape_cast %12 : vector<8xf32> to vector<8x1xf32>
    %cst_12 = arith.constant 3.125000e-02 : f32
    %14 = vector.broadcast %cst_12 : f32 to vector<8x1xf32>
    %15 = arith.mulf %13, %14 : vector<8x1xf32>
    %16 = vector.broadcast %15 : vector<8x1xf32> to vector<8x128xf32>
    %17 = arith.subf %9, %16 : vector<8x128xf32>
    %18 = arith.mulf %17, %17 : vector<8x128xf32>
    %cst_13 = arith.constant dense<0.000000e+00> : vector<8xf32>
    %19 = vector.multi_reduction <add>, %18, %cst_13 [1] : vector<8x128xf32> to vector<8xf32>
    %20 = vector.shape_cast %19 : vector<8xf32> to vector<8x1xf32>
    %21 = arith.mulf %15, %15 : vector<8x1xf32>
    %cst_14 = arith.constant 9.600000e+01 : f32
    %22 = vector.broadcast %cst_14 : f32 to vector<8x1xf32>
    %23 = arith.mulf %22, %21 : vector<8x1xf32>
    %24 = arith.subf %20, %23 : vector<8x1xf32>
    %cst_15 = arith.constant 3.125000e-02 : f32
    %25 = vector.broadcast %cst_15 : f32 to vector<8x1xf32>
    %26 = arith.mulf %24, %25 : vector<8x1xf32>
    %cst_16 = arith.constant 9.99999974E-6 : f32
    %27 = vector.broadcast %cst_16 : f32 to vector<8x1xf32>
    %28 = arith.addf %26, %27 : vector<8x1xf32>
    %29 = math.rsqrt %28 : vector<8x1xf32>
    %30 = vector.broadcast %29 : vector<8x1xf32> to vector<8x128xf32>
    %31 = arith.mulf %17, %30 : vector<8x128xf32>
    %32 = vector.broadcast %10 : vector<1x128xf32> to vector<8x128xf32>
    %33 = arith.mulf %31, %32 : vector<8x128xf32>
    %34 = vector.broadcast %11 : vector<1x128xf32> to vector<8x128xf32>
    %35 = arith.addf %33, %34 : vector<8x128xf32>
    %cst_17 = arith.constant 5.000000e-01 : f32
    %36 = vector.broadcast %cst_17 : f32 to vector<8x128xf32>
    %37 = arith.mulf %36, %35 : vector<8x128xf32>
    %cst_18 = arith.constant 0.707106769 : f32
    %38 = vector.broadcast %cst_18 : f32 to vector<8x128xf32>
    %39 = arith.mulf %35, %38 : vector<8x128xf32>
    %40 = math.erf %39 : vector<8x128xf32>
    %cst_19 = arith.constant 1.000000e+00 : f32
    %41 = vector.broadcast %cst_19 : f32 to vector<8x128xf32>
    %42 = arith.addf %41, %40 : vector<8x128xf32>
    %43 = arith.mulf %37, %42 : vector<8x128xf32>
    %44 = arith.truncf %43 : vector<8x128xf32> to vector<8x128xbf16>
    %c0_20 = arith.constant 0 : index
    %c0_21 = arith.constant 0 : index
    %45 = vector.load %arg7[%c0_20, %c0_21] : memref<128x128xbf16, #tpu.memory_space<vmem>>, vector<128x128xbf16>
    %cst_22 = arith.constant dense<0.000000e+00> : vector<8x128xf32>
    %46 = tpu.matmul %44, %45, %cst_22 {dimension_numbers = #tpu.dot_dimension_numbers<[1], [0], [0], [1], [0, 0, 1, 1], [], []>} : vector<8x128xbf16>, vector<128x128xbf16>, vector<8x128xf32> -> vector<8x128xf32>
    %c0_23 = arith.constant 0 : index
    %c0_24 = arith.constant 0 : index
    %47 = vector.load %arg8[%c0_23, %c0_24] : memref<1x128xf32, #tpu.memory_space<vmem>>, vector<1x128xf32>
    %48 = vector.broadcast %47 : vector<1x128xf32> to vector<8x128xf32>
    %49 = arith.addf %46, %48 : vector<8x128xf32>
    %c0_25 = arith.constant 0 : index
    %c0_26 = arith.constant 0 : index
    %50 = vector.load %arg9[%c0_25, %c0_26] : memref<1x128xf32, #tpu.memory_space<vmem>>, vector<1x128xf32>
    %c0_27 = arith.constant 0 : index
    %c0_28 = arith.constant 0 : index
    %51 = vector.load %arg10[%c0_27, %c0_28] : memref<1x128xf32, #tpu.memory_space<vmem>>, vector<1x128xf32>
    %cst_29 = arith.constant dense<0.000000e+00> : vector<8xf32>
    %52 = vector.multi_reduction <add>, %49, %cst_29 [1] : vector<8x128xf32> to vector<8xf32>
    %53 = vector.shape_cast %52 : vector<8xf32> to vector<8x1xf32>
    %cst_30 = arith.constant 3.125000e-02 : f32
    %54 = vector.broadcast %cst_30 : f32 to vector<8x1xf32>
    %55 = arith.mulf %53, %54 : vector<8x1xf32>
    %56 = vector.broadcast %55 : vector<8x1xf32> to vector<8x128xf32>
    %57 = arith.subf %49, %56 : vector<8x128xf32>
    %58 = arith.mulf %57, %57 : vector<8x128xf32>
    %cst_31 = arith.constant dense<0.000000e+00> : vector<8xf32>
    %59 = vector.multi_reduction <add>, %58, %cst_31 [1] : vector<8x128xf32> to vector<8xf32>
    %60 = vector.shape_cast %59 : vector<8xf32> to vector<8x1xf32>
    %61 = arith.mulf %55, %55 : vector<8x1xf32>
    %cst_32 = arith.constant 9.600000e+01 : f32
    %62 = vector.broadcast %cst_32 : f32 to vector<8x1xf32>
    %63 = arith.mulf %62, %61 : vector<8x1xf32>
    %64 = arith.subf %60, %63 : vector<8x1xf32>
    %cst_33 = arith.constant 3.125000e-02 : f32
    %65 = vector.broadcast %cst_33 : f32 to vector<8x1xf32>
    %66 = arith.mulf %64, %65 : vector<8x1xf32>
    %cst_34 = arith.constant 9.99999974E-6 : f32
    %67 = vector.broadcast %cst_34 : f32 to vector<8x1xf32>
    %68 = arith.addf %66, %67 : vector<8x1xf32>
    %69 = math.rsqrt %68 : vector<8x1xf32>
    %70 = vector.broadcast %69 : vector<8x1xf32> to vector<8x128xf32>
    %71 = arith.mulf %57, %70 : vector<8x128xf32>
    %72 = vector.broadcast %50 : vector<1x128xf32> to vector<8x128xf32>
    %73 = arith.mulf %71, %72 : vector<8x128xf32>
    %74 = vector.broadcast %51 : vector<1x128xf32> to vector<8x128xf32>
    %75 = arith.addf %73, %74 : vector<8x128xf32>
    %cst_35 = arith.constant 5.000000e-01 : f32
    %76 = vector.broadcast %cst_35 : f32 to vector<8x128xf32>
    %77 = arith.mulf %76, %75 : vector<8x128xf32>
    %cst_36 = arith.constant 0.707106769 : f32
    %78 = vector.broadcast %cst_36 : f32 to vector<8x128xf32>
    %79 = arith.mulf %75, %78 : vector<8x128xf32>
    %80 = math.erf %79 : vector<8x128xf32>
    %cst_37 = arith.constant 1.000000e+00 : f32
    %81 = vector.broadcast %cst_37 : f32 to vector<8x128xf32>
    %82 = arith.addf %81, %80 : vector<8x128xf32>
    %83 = arith.mulf %77, %82 : vector<8x128xf32>
    %84 = arith.truncf %83 : vector<8x128xf32> to vector<8x128xbf16>
    %c0_38 = arith.constant 0 : index
    %c0_39 = arith.constant 0 : index
    %85 = vector.load %arg11[%c0_38, %c0_39] : memref<128x32xbf16, #tpu.memory_space<vmem>>, vector<128x32xbf16>
    %cst_40 = arith.constant dense<0.000000e+00> : vector<8x32xf32>
    %86 = tpu.matmul %84, %85, %cst_40 {dimension_numbers = #tpu.dot_dimension_numbers<[1], [0], [0], [1], [0, 0, 1, 1], [], []>} : vector<8x128xbf16>, vector<128x32xbf16>, vector<8x32xf32> -> vector<8x32xf32>
    %c0_41 = arith.constant 0 : index
    %c0_42 = arith.constant 0 : index
    %87 = vector.load %arg12[%c0_41, %c0_42] : memref<1x32xf32, #tpu.memory_space<vmem>>, vector<1x32xf32>
    %88 = vector.broadcast %87 : vector<1x32xf32> to vector<8x32xf32>
    %89 = arith.addf %86, %88 : vector<8x32xf32>
    %90 = vector.shape_cast %89 : vector<8x32xf32> to vector<1x8x32xf32>
    %c0_43 = arith.constant 0 : index
    %c0_44 = arith.constant 0 : index
    %c0_45 = arith.constant 0 : index
    %91 = vector.load %arg13[%c0_43, %c0_44, %c0_45] : memref<1x8x32xf32, #tpu.memory_space<vmem>>, vector<1x8x32xf32>
    tpu.vector_store %arg13[%c0_43, %c0_44, %c0_45], %90 {strides = array<i32>} : memref<1x8x32xf32, #tpu.memory_space<vmem>>, vector<1x8x32xf32>,
    return
  }
  func.func @transform_0(%arg0: i32, %arg1: i32) -> (i32, i32, i32) {
    %c0_i32 = arith.constant 0 : i32
    %c0_i32_0 = arith.constant 0 : i32
    return %arg0, %arg1, %c0_i32 : i32, i32, i32
  }
  func.func @transform_1(%arg0: i32, %arg1: i32) -> (i32, i32, i32) {
    %c0_i32 = arith.constant 0 : i32
    %c0_i32_0 = arith.constant 0 : i32
    %c0_i32_1 = arith.constant 0 : i32
    return %arg0, %c0_i32, %c0_i32_0 : i32, i32, i32
  }
  func.func @transform_2(%arg0: i32, %arg1: i32) -> (i32, i32) {
    %c0_i32 = arith.constant 0 : i32
    %c0_i32_0 = arith.constant 0 : i32
    %c0_i32_1 = arith.constant 0 : i32
    return %c0_i32, %c0_i32_0 : i32, i32
  }
  func.func @transform_3(%arg0: i32, %arg1: i32) -> (i32, i32) {
    %c0_i32 = arith.constant 0 : i32
    %c0_i32_0 = arith.constant 0 : i32
    %c0_i32_1 = arith.constant 0 : i32
    return %c0_i32, %c0_i32_0 : i32, i32
  }
  func.func @transform_4(%arg0: i32, %arg1: i32) -> (i32, i32) {
    %c0_i32 = arith.constant 0 : i32
    %c0_i32_0 = arith.constant 0 : i32
    %c0_i32_1 = arith.constant 0 : i32
    return %c0_i32, %c0_i32_0 : i32, i32
  }
  func.func @transform_5(%arg0: i32, %arg1: i32) -> (i32, i32) {
    %c0_i32 = arith.constant 0 : i32
    %c0_i32_0 = arith.constant 0 : i32
    %c0_i32_1 = arith.constant 0 : i32
    return %c0_i32, %c0_i32_0 : i32, i32
  }
  func.func @transform_6(%arg0: i32, %arg1: i32) -> (i32, i32) {
    %c0_i32 = arith.constant 0 : i32
    %c0_i32_0 = arith.constant 0 : i32
    %c0_i32_1 = arith.constant 0 : i32
    return %c0_i32, %c0_i32_0 : i32, i32
  }
  func.func @transform_7(%arg0: i32, %arg1: i32) -> (i32, i32) {
    %c0_i32 = arith.constant 0 : i32
    %c0_i32_0 = arith.constant 0 : i32
    %c0_i32_1 = arith.constant 0 : i32
    return %c0_i32, %c0_i32_0 : i32, i32
  }
  func.func @transform_8(%arg0: i32, %arg1: i32) -> (i32, i32) {
    %c0_i32 = arith.constant 0 : i32
    %c0_i32_0 = arith.constant 0 : i32
    %c0_i32_1 = arith.constant 0 : i32
    return %c0_i32, %c0_i32_0 : i32, i32
  }
  func.func @transform_9(%arg0: i32, %arg1: i32) -> (i32, i32) {
    %c0_i32 = arith.constant 0 : i32
    %c0_i32_0 = arith.constant 0 : i32
    %c0_i32_1 = arith.constant 0 : i32
    return %c0_i32, %c0_i32_0 : i32, i32
  }
  func.func @transform_10(%arg0: i32, %arg1: i32) -> (i32, i32) {
    %c0_i32 = arith.constant 0 : i32
    %c0_i32_0 = arith.constant 0 : i32
    %c0_i32_1 = arith.constant 0 : i32
    return %c0_i32, %c0_i32_0 : i32, i32
  }
  func.func @transform_11(%arg0: i32, %arg1: i32) -> (i32, i32, i32) {
    %c0_i32 = arith.constant 0 : i32
    %c0_i32_0 = arith.constant 0 : i32
    return %arg0, %arg1, %c0_i32 : i32, i32, i32
  }
}

module attributes {stable_mosaic.version = 11 : i64} {
  func.func @dynamics_mlp_kernel(%arg0: i32, %arg1: i32, %arg2: memref<1x8x32xf32, #tpu.memory_space<vmem>>, %arg3: memref<1x1x128xf32, #tpu.memory_space<vmem>>, %arg4: memref<32x128xbf16, #tpu.memory_space<vmem>>, %arg5: memref<1x128xf32, #tpu.memory_space<vmem>>, %arg6: memref<1x128xf32, #tpu.memory_space<vmem>>, %arg7: memref<128x128xbf16, #tpu.memory_space<vmem>>, %arg8: memref<1x128xf32, #tpu.memory_space<vmem>>, %arg9: memref<1x128xf32, #tpu.memory_space<vmem>>, %arg10: memref<1x128xf32, #tpu.memory_space<vmem>>, %arg11: memref<128x32xbf16, #tpu.memory_space<vmem>>, %arg12: memref<1x32xf32, #tpu.memory_space<vmem>>, %arg13: memref<1x8x32xf32, #tpu.memory_space<vmem>>) attributes {dimension_semantics = [#tpu.dimension_semantics<parallel>, #tpu.dimension_semantics<parallel>], iteration_bounds = array<i64: 2, 1>, scalar_prefetch = 0 : i64, scratch_operands = 0 : i64, tpu.core_type = #tpu.core_type<tc>, window_params = [{transform_indices = @transform_0, window_bounds = array<i64: 1, 8, 32>}, {transform_indices = @transform_1, window_bounds = array<i64: 1, 1, 128>}, {pipeline_mode = #tpu.pipeline_mode<synchronous>, transform_indices = @transform_2, window_bounds = array<i64: 32, 128>}, {pipeline_mode = #tpu.pipeline_mode<synchronous>, transform_indices = @transform_3, window_bounds = array<i64: 1, 128>}, {pipeline_mode = #tpu.pipeline_mode<synchronous>, transform_indices = @transform_4, window_bounds = array<i64: 1, 128>}, {pipeline_mode = #tpu.pipeline_mode<synchronous>, transform_indices = @transform_5, window_bounds = array<i64: 128, 128>}, {pipeline_mode = #tpu.pipeline_mode<synchronous>, transform_indices = @transform_6, window_bounds = array<i64: 1, 128>}, {pipeline_mode = #tpu.pipeline_mode<synchronous>, transform_indices = @transform_7, window_bounds = array<i64: 1, 128>}, {pipeline_mode = #tpu.pipeline_mode<synchronous>, transform_indices = @transform_8, window_bounds = array<i64: 1, 128>}, {pipeline_mode = #tpu.pipeline_mode<synchronous>, transform_indices = @transform_9, window_bounds = array<i64: 128, 32>}, {pipeline_mode = #tpu.pipeline_mode<synchronous>, transform_indices = @transform_10, window_bounds = array<i64: 1, 32>}, {transform_indices = @transform_11, window_bounds = array<i64: 1, 8, 32>}]} {
    %c0 = arith.constant 0 : index
    %c0_0 = arith.constant 0 : index
    %c0_1 = arith.constant 0 : index
    %0 = vector.load %arg2[%c0, %c0_0, %c0_1] : memref<1x8x32xf32, #tpu.memory_space<vmem>>, vector<1x8x32xf32>
    %1 = vector.shape_cast %0 : vector<1x8x32xf32> to vector<8x32xf32>
    %2 = arith.truncf %1 : vector<8x32xf32> to vector<8x32xbf16>
    %c0_2 = arith.constant 0 : index
    %c0_3 = arith.constant 0 : index
    %3 = vector.load %arg4[%c0_2, %c0_3] : memref<32x128xbf16, #tpu.memory_space<vmem>>, vector<32x128xbf16>
    %cst = arith.constant dense<0.000000e+00> : vector<8x128xf32>
    %4 = tpu.matmul %2, %3, %cst {dimension_numbers = #tpu.dot_dimension_numbers<[1], [0], [0], [1], [0, 0, 1, 1], [], []>} : vector<8x32xbf16>, vector<32x128xbf16>, vector<8x128xf32> -> vector<8x128xf32>
    %5 = vector.shape_cast %4 : vector<8x128xf32> to vector<1x8x128xf32>
    %c0_4 = arith.constant 0 : index
    %c0_5 = arith.constant 0 : index
    %c0_6 = arith.constant 0 : index
    %6 = vector.load %arg3[%c0_4, %c0_5, %c0_6] : memref<1x1x128xf32, #tpu.memory_space<vmem>>, vector<1x1x128xf32>
    %7 = vector.broadcast %6 : vector<1x1x128xf32> to vector<1x8x128xf32>
    %8 = arith.addf %5, %7 : vector<1x8x128xf32>
    %9 = vector.shape_cast %8 : vector<1x8x128xf32> to vector<8x128xf32>
    %c0_7 = arith.constant 0 : index
    %c0_8 = arith.constant 0 : index
    %10 = vector.load %arg5[%c0_7, %c0_8] : memref<1x128xf32, #tpu.memory_space<vmem>>, vector<1x128xf32>
    %c0_9 = arith.constant 0 : index
    %c0_10 = arith.constant 0 : index
    %11 = vector.load %arg6[%c0_9, %c0_10] : memref<1x128xf32, #tpu.memory_space<vmem>>, vector<1x128xf32>
    %cst_11 = arith.constant dense<0.000000e+00> : vector<8xf32>
    %12 = vector.multi_reduction <add>, %9, %cst_11 [1] : vector<8x128xf32> to vector<8xf32>
    %13 = vector.shape_cast %12 : vector<8xf32> to vector<8x1xf32>
    %cst_12 = arith.constant 3.125000e-02 : f32
    %14 = vector.broadcast %cst_12 : f32 to vector<8x1xf32>
    %15 = arith.mulf %13, %14 : vector<8x1xf32>
    %16 = vector.broadcast %15 : vector<8x1xf32> to vector<8x128xf32>
    %17 = arith.subf %9, %16 : vector<8x128xf32>
    %18 = arith.mulf %17, %17 : vector<8x128xf32>
    %cst_13 = arith.constant dense<0.000000e+00> : vector<8xf32>
    %19 = vector.multi_reduction <add>, %18, %cst_13 [1] : vector<8x128xf32> to vector<8xf32>
    %20 = vector.shape_cast %19 : vector<8xf32> to vector<8x1xf32>
    %21 = arith.mulf %15, %15 : vector<8x1xf32>
    %cst_14 = arith.constant 9.600000e+01 : f32
    %22 = vector.broadcast %cst_14 : f32 to vector<8x1xf32>
    %23 = arith.mulf %22, %21 : vector<8x1xf32>
    %24 = arith.subf %20, %23 : vector<8x1xf32>
    %cst_15 = arith.constant 3.125000e-02 : f32
    %25 = vector.broadcast %cst_15 : f32 to vector<8x1xf32>
    %26 = arith.mulf %24, %25 : vector<8x1xf32>
    %cst_16 = arith.constant 9.99999974E-6 : f32
    %27 = vector.broadcast %cst_16 : f32 to vector<8x1xf32>
    %28 = arith.addf %26, %27 : vector<8x1xf32>
    %29 = math.rsqrt %28 : vector<8x1xf32>
    %30 = vector.broadcast %29 : vector<8x1xf32> to vector<8x128xf32>
    %31 = arith.mulf %17, %30 : vector<8x128xf32>
    %32 = vector.broadcast %10 : vector<1x128xf32> to vector<8x128xf32>
    %33 = arith.mulf %31, %32 : vector<8x128xf32>
    %34 = vector.broadcast %11 : vector<1x128xf32> to vector<8x128xf32>
    %35 = arith.addf %33, %34 : vector<8x128xf32>
    %cst_17 = arith.constant 5.000000e-01 : f32
    %36 = vector.broadcast %cst_17 : f32 to vector<8x128xf32>
    %37 = arith.mulf %36, %35 : vector<8x128xf32>
    %cst_18 = arith.constant 0.707106769 : f32
    %38 = vector.broadcast %cst_18 : f32 to vector<8x128xf32>
    %39 = arith.mulf %35, %38 : vector<8x128xf32>
    %40 = math.erf %39 : vector<8x128xf32>
    %cst_19 = arith.constant 1.000000e+00 : f32
    %41 = vector.broadcast %cst_19 : f32 to vector<8x128xf32>
    %42 = arith.addf %41, %40 : vector<8x128xf32>
    %43 = arith.mulf %37, %42 : vector<8x128xf32>
    %44 = arith.truncf %43 : vector<8x128xf32> to vector<8x128xbf16>
    %c0_20 = arith.constant 0 : index
    %c0_21 = arith.constant 0 : index
    %45 = vector.load %arg7[%c0_20, %c0_21] : memref<128x128xbf16, #tpu.memory_space<vmem>>, vector<128x128xbf16>
    %cst_22 = arith.constant dense<0.000000e+00> : vector<8x128xf32>
    %46 = tpu.matmul %44, %45, %cst_22 {dimension_numbers = #tpu.dot_dimension_numbers<[1], [0], [0], [1], [0, 0, 1, 1], [], []>} : vector<8x128xbf16>, vector<128x128xbf16>, vector<8x128xf32> -> vector<8x128xf32>
    %c0_23 = arith.constant 0 : index
    %c0_24 = arith.constant 0 : index
    %47 = vector.load %arg8[%c0_23, %c0_24] : memref<1x128xf32, #tpu.memory_space<vmem>>, vector<1x128xf32>
    %48 = vector.broadcast %47 : vector<1x128xf32> to vector<8x128xf32>
    %49 = arith.addf %46, %48 : vector<8x128xf32>
    %c0_25 = arith.constant 0 : index
    %c0_26 = arith.constant 0 : index
    %50 = vector.load %arg9[%c0_25, %c0_26] : memref<1x128xf32, #tpu.memory_space<vmem>>, vector<1x128xf32>
    %c0_27 = arith.constant 0 : index
    %c0_28 = arith.constant 0 : index
    %51 = vector.load %arg10[%c0_27, %c0_28] : memref<1x128xf32, #tpu.memory_space<vmem>>, vector<1x128xf32>
    %cst_29 = arith.constant dense<0.000000e+00> : vector<8xf32>
    %52 = vector.multi_reduction <add>, %49, %cst_29 [1] : vector<8x128xf32> to vector<8xf32>
    %53 = vector.shape_cast %52 : vector<8xf32> to vector<8x1xf32>
    %cst_30 = arith.constant 3.125000e-02 : f32
    %54 = vector.broadcast %cst_30 : f32 to vector<8x1xf32>
    %55 = arith.mulf %53, %54 : vector<8x1xf32>
    %56 = vector.broadcast %55 : vector<8x1xf32> to vector<8x128xf32>
    %57 = arith.subf %49, %56 : vector<8x128xf32>
    %58 = arith.mulf %57, %57 : vector<8x128xf32>
    %cst_31 = arith.constant dense<0.000000e+00> : vector<8xf32>
    %59 = vector.multi_reduction <add>, %58, %cst_31 [1] : vector<8x128xf32> to vector<8xf32>
    %60 = vector.shape_cast %59 : vector<8xf32> to vector<8x1xf32>
    %61 = arith.mulf %55, %55 : vector<8x1xf32>
    %cst_32 = arith.constant 9.600000e+01 : f32
    %62 = vector.broadcast %cst_32 : f32 to vector<8x1xf32>
    %63 = arith.mulf %62, %61 : vector<8x1xf32>
    %64 = arith.subf %60, %63 : vector<8x1xf32>
    %cst_33 = arith.constant 3.125000e-02 : f32
    %65 = vector.broadcast %cst_33 : f32 to vector<8x1xf32>
    %66 = arith.mulf %64, %65 : vector<8x1xf32>
    %cst_34 = arith.constant 9.99999974E-6 : f32
    %67 = vector.broadcast %cst_34 : f32 to vector<8x1xf32>
    %68 = arith.addf %66, %67 : vector<8x1xf32>
    %69 = math.rsqrt %68 : vector<8x1xf32>
    %70 = vector.broadcast %69 : vector<8x1xf32> to vector<8x128xf32>
    %71 = arith.mulf %57, %70 : vector<8x128xf32>
    %72 = vector.broadcast %50 : vector<1x128xf32> to vector<8x128xf32>
    %73 = arith.mulf %71, %72 : vector<8x128xf32>
    %74 = vector.broadcast %51 : vector<1x128xf32> to vector<8x128xf32>
    %75 = arith.addf %73, %74 : vector<8x128xf32>
    %cst_35 = arith.constant 5.000000e-01 : f32
    %76 = vector.broadcast %cst_35 : f32 to vector<8x128xf32>
    %77 = arith.mulf %76, %75 : vector<8x128xf32>
    %cst_36 = arith.constant 0.707106769 : f32
    %78 = vector.broadcast %cst_36 : f32 to vector<8x128xf32>
    %79 = arith.mulf %75, %78 : vector<8x128xf32>
    %80 = math.erf %79 : vector<8x128xf32>
    %cst_37 = arith.constant 1.000000e+00 : f32
    %81 = vector.broadcast %cst_37 : f32 to vector<8x128xf32>
    %82 = arith.addf %81, %80 : vector<8x128xf32>
    %83 = arith.mulf %77, %82 : vector<8x128xf32>
    %84 = arith.truncf %83 : vector<8x128xf32> to vector<8x128xbf16>
    %c0_38 = arith.constant 0 : index
    %c0_39 = arith.constant 0 : index
    %85 = vector.load %arg11[%c0_38, %c0_39] : memref<128x32xbf16, #tpu.memory_space<vmem>>, vector<128x32xbf16>
    %cst_40 = arith.constant dense<0.000000e+00> : vector<8x32xf32>
    %86 = tpu.matmul %84, %85, %cst_40 {dimension_numbers = #tpu.dot_dimension_numbers<[1], [0], [0], [1], [0, 0, 1, 1], [], []>} : vector<8x128xbf16>, vector<128x32xbf16>, vector<8x32xf32> -> vector<8x32xf32>
    %c0_41 = arith.constant 0 : index
    %c0_42 = arith.constant 0 : index
    %87 = vector.load %arg12[%c0_41, %c0_42] : memref<1x32xf32, #tpu.memory_space<vmem>>, vector<1x32xf32>
    %88 = vector.broadcast %87 : vector<1x32xf32> to vector<8x32xf32>
    %89 = arith.addf %86, %88 : vector<8x32xf32>
    %90 = vector.shape_cast %89 : vector<8x32xf32> to vector<1x8x32xf32>
    %c0_43 = arith.constant 0 : index
    %c0_44 = arith.constant 0 : index
    %c0_45 = arith.constant 0 : index
    %91 = vector.load %arg13[%c0_43, %c0_44, %c0_45] : memref<1x8x32xf32, #tpu.memory_space<vmem>>, vector<1x8x32xf32>
    tpu.vector_store %arg13[%c0_43, %c0_44, %c0_45], %90 {strides = array<i32>} : memref<1x8x32xf32, #tpu.memory_space<vmem>>, vector<1x8x32xf32>,
    return
  }
  func.func @transform_0(%arg0: i32, %arg1: i32) -> (i32, i32, i32) {
    %c0_i32 = arith.constant 0 : i32
    %c0_i32_0 = arith.constant 0 : i32
    return %arg0, %arg1, %c0_i32 : i32, i32, i32
  }
  func.func @transform_1(%arg0: i32, %arg1: i32) -> (i32, i32, i32) {
    %c0_i32 = arith.constant 0 : i32
    %c0_i32_0 = arith.constant 0 : i32
    %c0_i32_1 = arith.constant 0 : i32
    return %arg0, %c0_i32, %c0_i32_0 : i32, i32, i32
  }
  func.func @transform_2(%arg0: i32, %arg1: i32) -> (i32, i32) {
    %c0_i32 = arith.constant 0 : i32
    %c0_i32_0 = arith.constant 0 : i32
    %c0_i32_1 = arith.constant 0 : i32
    return %c0_i32, %c0_i32_0 : i32, i32
  }
  func.func @transform_3(%arg0: i32, %arg1: i32) -> (i32, i32) {
    %c0_i32 = arith.constant 0 : i32
    %c0_i32_0 = arith.constant 0 : i32
    %c0_i32_1 = arith.constant 0 : i32
    return %c0_i32, %c0_i32_0 : i32, i32
  }
  func.func @transform_4(%arg0: i32, %arg1: i32) -> (i32, i32) {
    %c0_i32 = arith.constant 0 : i32
    %c0_i32_0 = arith.constant 0 : i32
    %c0_i32_1 = arith.constant 0 : i32
    return %c0_i32, %c0_i32_0 : i32, i32
  }
  func.func @transform_5(%arg0: i32, %arg1: i32) -> (i32, i32) {
    %c0_i32 = arith.constant 0 : i32
    %c0_i32_0 = arith.constant 0 : i32
    %c0_i32_1 = arith.constant 0 : i32
    return %c0_i32, %c0_i32_0 : i32, i32
  }
  func.func @transform_6(%arg0: i32, %arg1: i32) -> (i32, i32) {
    %c0_i32 = arith.constant 0 : i32
    %c0_i32_0 = arith.constant 0 : i32
    %c0_i32_1 = arith.constant 0 : i32
    return %c0_i32, %c0_i32_0 : i32, i32
  }
  func.func @transform_7(%arg0: i32, %arg1: i32) -> (i32, i32) {
    %c0_i32 = arith.constant 0 : i32
    %c0_i32_0 = arith.constant 0 : i32
    %c0_i32_1 = arith.constant 0 : i32
    return %c0_i32, %c0_i32_0 : i32, i32
  }
  func.func @transform_8(%arg0: i32, %arg1: i32) -> (i32, i32) {
    %c0_i32 = arith.constant 0 : i32
    %c0_i32_0 = arith.constant 0 : i32
    %c0_i32_1 = arith.constant 0 : i32
    return %c0_i32, %c0_i32_0 : i32, i32
  }
  func.func @transform_9(%arg0: i32, %arg1: i32) -> (i32, i32) {
    %c0_i32 = arith.constant 0 : i32
    %c0_i32_0 = arith.constant 0 : i32
    %c0_i32_1 = arith.constant 0 : i32
    return %c0_i32, %c0_i32_0 : i32, i32
  }
  func.func @transform_10(%arg0: i32, %arg1: i32) -> (i32, i32) {
    %c0_i32 = arith.constant 0 : i32
    %c0_i32_0 = arith.constant 0 : i32
    %c0_i32_1 = arith.constant 0 : i32
    return %c0_i32, %c0_i32_0 : i32, i32
  }
  func.func @transform_11(%arg0: i32, %arg1: i32) -> (i32, i32, i32) {
    %c0_i32 = arith.constant 0 : i32
    %c0_i32_0 = arith.constant 0 : i32
    return %arg0, %arg1, %c0_i32 : i32, i32, i32
  }
}

</mosaic_0001>

<bundles_post_ra>
// kernel: tpu_custom_call.1
= control target key start
LH: loop header
LB: loop body
LE: loop exit
PB: predicated region body
PF: predicated region fallthrough
CT: control target
= control target key end

     0   :  { %16 = vsyncpa [#allocation3], 0  ;;  %s1536_s0 = inlined_call_operand.vmem [shape: f32[2,8,32], index: 0, kind: input, shape index: {}]   ;;  %s1537_s1 = inlined_call_operand.vmem [shape: f32[2,1,128], index: 1, kind: input, shape index: {}]   ;;  %s1538_s2 = inlined_call_operand.hbm [shape: bf16[32,128], index: 2, kind: input, shape index: {}]   ;;  %s1539_s3 = inlined_call_operand.vmem [shape: f32[1,128], index: 3, kind: input, shape index: {}]   ;;  %s1540_s4 = inlined_call_operand.vmem [shape: f32[1,128], index: 4, kind: input, shape index: {}]   ;;  %s1541_s5 = inlined_call_operand.vmem [shape: bf16[128,128], index: 5, kind: input, shape index: {}]   ;;  %s1542_s6 = inlined_call_operand.vmem [shape: f32[1,128], index: 6, kind: input, shape index: {}]   ;;  %s1543_s7 = inlined_call_operand.vmem [shape: f32[1,128], index: 7, kind: input, shape index: {}]   ;;  %s1544_s8 = inlined_call_operand.vmem [shape: f32[1,128], index: 8, kind: input, shape index: {}]   ;;  %s1545_s9 = inlined_call_operand.vmem [shape: bf16[128,32], index: 9, kind: input, shape index: {}]   ;;  %s1546_s10 = inlined_call_operand.vmem [shape: f32[1,32], index: 10, kind: input, shape index: {}]   ;;  %s1547_s11 = inlined_call_operand.hbm [shape: f32[2,8,32], index: 11, kind: output, shape index: {}]  }
   0x1   :  { %17 = vsyncpa [#allocation4], 0 }
   0x2   :  { %19 = vsyncpa [#allocation4 + $0x1], 0  ;;  %s1291_s17 = smov 0   ;;  %s1293_s18 = smov 0  }
   0x3   :  { %s1295_s19 = smov 0   ;;  %s1297_s20 = smov 0  }
   0x4   :  { %s1299_s21 = smov 0   ;;  %s1301_s22 = smov 0  }
   0x5 LB: > { %1554 = sst [smem:[#allocation8_spill]] %s1219_s21  ;;  %s909_s23 = sadd.s32 4294967295, %s1223_s22   ;;  %s1223_s22 = sphi %s1301_s22, %s25_s22   ;;  %s1219_s21 = sphi %s1299_s21, %s1568_s21   ;;  %s1215_s20 = sphi %s1297_s20, %s1567_s20   ;;  %s1211_s19 = sphi %s1295_s19, %s1571_s19   ;;  %s1207_s18 = sphi %s1293_s18, %s1570_s18   ;;  %s1203_s17 = sphi %s1291_s17, %s1569_s17  }
   0x6   : > { %s910_s24 = sadd.s32 4294967294, %s1223_s22   ;;  %s37_s25 = sadd.s32 1, %s1219_s21 }
   0x7   : > { %s289_s26 = sadd.s32 1, %s1211_s19  ;;  %p39_p0 = scmp.ge.s32.totalorder %s37_s25, 2 }
   0x8   : > { %p299_p1 = scmp.ne.s32.totalorder %s1211_s19, %s1207_s18  ;;  %p300_p2 = scmp.eq.s32.totalorder %s909_s23, 1 }
   0x9   : > { %p305_p3 = scmp.ne.s32.totalorder %s1207_s18, %s1203_s17  ;;  %s1573_s25 = smov (%p39_p0, %s37_s25), 0 }
   0xa   : > { %1555 = sst [smem:[#allocation9_spill]] %s1573_s25  ;;  %p1331_p4 = por %p300_p2, %p299_p1 }
   0xb   : > { %p306_p5 = scmp.eq.s32.totalorder %s910_s24, 1  ;;  %s284_s28 = ssub.s32 %s1219_s21, %s1573_s25 }
   0xc   : > { %s1556_s27 = scalar_select %p1331_p4, 1, 0 }
   0xd   : > { %p911_p6 = scmp.ge.s32.totalorder %s1223_s22, 1  ;;  %p287_p7 = scmp.eq.s32.totalorder %s284_s28, 0 }
   0xe   : > { %p1338_p8 = por %p306_p5, %p305_p3  ;;  %p313_p9 = scmp.lt.s32.totalorder %s1223_s22, 3 }
   0xf   : > { %s1344_s30 = scalar_select %p287_p7, %s1211_s19, %s289_s26  }
  0x10   : > { %s1557_s29 = scalar_select %p1338_p8, 1, 0 }
  0x11   : > { %1558 = sst [smem:[#allocation10_spill]] %s1344_s30  ;;  %p1346_p10 = pnand %p911_p6, %p313_p9 }
  0x12   : > { %p1350_p11 = scmp.eq.s32.totalorder %s909_s23, 0  ;;  %s1225_s14 = smov [#allocation2]  }
  0x13   : > { %s1559_s12 = scalar_select %p1346_p10, 1, 0 }
  0x14   : > { %s1560_s13 = scalar_select %p1350_p11, 1, 0 }
  0x15   : > { %p1023_p12 = pneg %p1346_p10  ;;  %s325_s15 = sshll.u32 %s1225_s14, 4  ;;  %s326_s15 = int_to_ptr.vmem [resolvable:$true] %s325_s15 }
  0x16   : > { %s1113_s28 = scalar_lea.hbm %s1538_s2, 256 }
  0x17   : > { %p1358_p13 = pnand %p1350_p11, %p1023_p12  ;;  %p1114_p0 = scmp.ne.s32.totalorder %s1538_s2, %s1113_s28 }
  0x18   : > { %p1120_p5 = scmp.lt.u32.totalorder %s1113_s28, %s1538_s2 }
  0x19   : > { %p1115_p1 = pneg %p1358_p13 }
  0x1b   : > { %p1116_p2 = pnand %p1115_p1, %p1114_p0 }
  0x1d   : > { %p1117_p3 = pneg %p1116_p2 }
  0x1f   : > { %p1122_p6 = pnand %p1120_p5, %p1117_p3 }
  0x21   : > { %1125 = shalt.err (!%p1122_p6)
}
  0x22   : > { %s1126_s30 = scalar_lea.vmem %s326_s15, 256  ;;  %p1134_p8 = scmp.lt.s32.totalorder %s326_s15, %s326_s15 }
  0x23   : > { %p1127_p7 = scmp.ne.s32.totalorder %s326_s15, %s1126_s30  ;;  %p1135_p4 = scmp.lt.s32.totalorder %s1126_s30, %s1126_s30 }
  0x25   : > { %p1129_p9 = pnand %p1127_p7, %p1115_p1  ;;  %p1136_p11 = por %p1135_p4, %p1134_p8 }
  0x27   : > { %p1130_p12 = pneg %p1129_p9 }
  0x29   : > { %p1137_p10 = pnand %p1136_p11, %p1130_p12 }
  0x2b   : > { %1140 = shalt.err (!%p1137_p10)
}
  0x2c   : > { %s1226_s25 = smov 64   ;;  %s1227_s24 = smov 4  }
  0x2d   : > { %1026 = dma.hbm_to_vmem [thread:$0]  (!%p1358_p13), %s1538_s2, 256, %s326_s15, [#allocation3], %s1226_s25, %s1226_s25, %s1227_s24  }
  0x2e   : > { %p1562_p0 = scmp.ne.s32.totalorder %s1559_s12, 0 }
  0x2f   : > { %p1563_p2 = scmp.ne.s32.totalorder (!%p1562_p0), %s1560_s13, 0 }
  0x30   : > { %381 = sbr.rel (%p1562_p0) target bundleno = 1386 (0x56a), region = 64 }
  0x37   : > { %1194 = dma.done.wait (%p1563_p2), [#allocation3], 256  }
  0x38   : > { %1196 = vsyncadd (%p1563_p2), [#allocation3], 4294967040  ;;  %p426_p4 = scmp.lt.s32.totalorder %s1215_s20, 1  ;;  %v1228_v0 = vmov 0.0   ;;  %vm1229_vm0 = vmmov 0   ;;  %v1087_v1 = vld [vmem:[#allocation2] sm:$0xff]  }
  0x39   : > { %969 = vmatprep.subr.bf16.mxu0 %v1228_v0  ;;  %973 = vmatprep.mubr.msk.bf16.mxu0 %vm1229_vm0, %v1228_v0  ;;  %v1088_v2 = vld [vmem:[#allocation2 + $0x8] sm:$0xff]   ;;  %vm455_vm1 = vcmask 261120   ;;  %v1089_v15 = vld [vmem:[%s1541_s5] sm:$0xff]   ;;  %v1091_v17 = vld [vmem:[%s1541_s5 + $0x10] sm:$0xff]   ;;  %s423_s12 = sand.u32 1, %s1207_s18   ;;  %s945_s28 = sshll.u32 %s1215_s20, 7 }
  0x3a   : > { %s427_s21 = scalar_select %p426_p4, %s1215_s20, 1  ;;  %977 = vmatprep.subr.bf16.mxu1 %v1228_v0  ;;  %993 = vmatprep.mubr.msk.bf16.mxu1 %vm1229_vm0, %v1228_v0  ;;  %v1090_v16 = vld [vmem:[%s1541_s5 + $0x8] sm:$0xff]   ;;  %v1092_v18 = vld [vmem:[%s1541_s5 + $0x18] sm:$0xff]   ;;  %v1093_v19 = vld [vmem:[%s1541_s5 + $0x20] sm:$0xff]  }
  0x3b   : > { %970 = vmatpush3.bf16.msra.mxu0 %v1087_v1  ;;  %978 = vmatpush3.bf16.msra.mxu1 %v1089_v15  ;;  %v1094_v20 = vld [vmem:[%s1541_s5 + $0x28] sm:$0xff]   ;;  %v1095_v21 = vld [vmem:[%s1541_s5 + $0x30] sm:$0xff]   ;;  %v1096_v22 = vld [vmem:[%s1541_s5 + $0x38] sm:$0xff]   ;;  %s916_s13 = sshll.u32 %s423_s12, 3  ;;  %s1488_s23 = scalar_lea.hbm %s1547_s11, %s945_s28 }
  0x3c   : > { %s917_s30 = sshll.u32 %s427_s21, 3  ;;  %971 = vmatprep.subr.bf16.mxu0 %v1228_v0  ;;  %s435_s14 = scalar_lea.vmem %s1537_s1, %s427_s21  ;;  %979 = vmatprep.subr.bf16.mxu1 %v1228_v0  ;;  %v922_v30 = vld [vmem:[%s1539_s3] ss:$0 sm:$0xff]  ;;  %v1098_v52 = vld [vmem:[%s1545_s9 + $0x8] sm:$0xff]   ;;  %v1099_v53 = vld [vmem:[%s1545_s9 + $0x10] sm:$0xff]  }
  0x3d   : > { %s432_s15 = scalar_lea.vmem %s1536_s0, %s917_s30  ;;  %v921_v5 = vld [vmem:[%s435_s14] ss:$0 sm:$0xff]  ;;  %v1100_v54 = vld [vmem:[%s1545_s9 + $0x18] sm:$0xff]   ;;  %v1102_v56 = vld [vmem:[%s1545_s9 + $0x28] sm:$0xff]   ;;  %s425_s14 = scalar_lea.vmem [#allocation5], %s916_s13 }
  0x3e   : > { %v437_v3 = vld [vmem:[%s432_s15] sm:$0xff]  ;;  %v1103_v57 = vld [vmem:[%s1545_s9 + $0x30] sm:$0xff]   ;;  %v1104_v58 = vld [vmem:[%s1545_s9 + $0x38] sm:$0xff]   ;;  %s817_s25 = sshll.u32 %s425_s14, 4  ;;  %s803_s20 = scalar_lea.sflag [#allocation4], %s423_s12  ;;  %s1490_s25 = int_to_ptr.vmem [resolvable:$true] %s817_s25 }
  0x3f   : > { %v438_v4 = vpack.c.bf16 %v437_v3, %v437_v3  ;;  %972 = vmatpush3.bf16.msra.mxu0 %v1088_v2  ;;  %980 = vmatpush3.bf16.msra.mxu1 %v1090_v16  ;;  %v923_v32 = vld [vmem:[%s1540_s4] ss:$0 sm:$0xff]  ;;  %s1141_s21 = scalar_lea.vmem %s1490_s25, 128  ;;  %p1564_p10 = scmp.ne.s32.totalorder %s1556_s27, 0 }
  0x40   : > { %997 = vmatprep.subr.bf16.mxu0 %v1228_v0  ;;  %981 = vmatprep.subr.bf16.mxu1 %v1228_v0  ;;  %v924_v41 = vld [vmem:[%s1542_s6] ss:$0 sm:$0xff]  ;;  %p1142_p8 = scmp.ne.s32.totalorder %s1490_s25, %s1141_s21  ;;  %s1230_s30 = smov [#allocation5]  }
  0x41   : > { %v1097_v51 = vld [vmem:[%s1545_s9] sm:$0xff]   ;;  %s1145_s13 = sshll.u32 %s1230_s30, 4  ;;  %s1146_s13 = int_to_ptr.vmem [resolvable:$false] %s1145_s13 }
  0x42   : > { %974 = vmatmul.mubr.msk.bf16.vlgmr.msra.gmra.mrb[0].mxu0 %vm455_vm1, %v438_v4  ;;  %v1101_v55 = vld [vmem:[%s1545_s9 + $0x20] sm:$0xff]   ;;  %p1143_p11 = pnand %p1142_p8, %p1564_p10  ;;  %s1147_s15 = scalar_lea.vmem %s1146_s13, 256 }
  0x43   : > { %1013 = vmatprep.mubr.msk.bf16.mxu0 %vm1229_vm0, %v1228_v0  ;;  %982 = vmatpush3.bf16.msra.mxu1 %v1091_v17  ;;  %v933_v3 = vld [vmem:[%s1543_s7] ss:$0 sm:$0xff]  ;;  %p1148_p1 = scmp.lt.s32.totalorder %s1490_s25, %s1146_s13  ;;  %p1149_p3 = scmp.lt.s32.totalorder %s1147_s15, %s1141_s21 }
  0x44   : > { %983 = vmatprep.subr.bf16.mxu1 %v1228_v0  ;;  %998 = vmatpush3.bf16.msra.mxu0 %v1097_v51  ;;  %p1144_p13 = pneg %p1143_p11 }
  0x45   : > { %999 = vmatprep.subr.bf16.mxu0 %v1228_v0  ;;  %p1150_p5 = por %p1149_p3, %p1148_p1 }
  0x47   : > { %984 = vmatpush3.bf16.msra.mxu1 %v1092_v18  ;;  %p1151_p6 = pnand %p1150_p5, %p1144_p13 }
  0x48   : > { %985 = vmatprep.subr.bf16.mxu1 %v1228_v0  ;;  %1000 = vmatpush3.bf16.msra.mxu0 %v1098_v52 }
  0x49   : > { %1001 = vmatprep.subr.bf16.mxu0 %v1228_v0 }
  0x4b   : > { %986 = vmatpush3.bf16.msra.mxu1 %v1093_v19 }
  0x4c   : > { %987 = vmatprep.subr.bf16.mxu1 %v1228_v0  ;;  %1002 = vmatpush3.bf16.msra.mxu0 %v1099_v53 }
  0x4d   : > { %1003 = vmatprep.subr.bf16.mxu0 %v1228_v0 }
  0x4f   : > { %988 = vmatpush3.bf16.msra.mxu1 %v1094_v20 }
  0x50   : > { %989 = vmatprep.subr.bf16.mxu1 %v1228_v0  ;;  %1004 = vmatpush3.bf16.msra.mxu0 %v1100_v54 }
  0x51   : > { %1005 = vmatprep.subr.bf16.mxu0 %v1228_v0 }
  0x53   : > { %990 = vmatpush3.bf16.msra.mxu1 %v1095_v21 }
  0x54   : > { %991 = vmatprep.subr.bf16.mxu1 %v1228_v0  ;;  %1006 = vmatpush3.bf16.msra.mxu0 %v1101_v55 }
  0x55   : > { %1007 = vmatprep.subr.bf16.mxu0 %v1228_v0 }
  0x57   : > { %992 = vmatpush3.bf16.msra.mxu1 %v1096_v22 }
  0x58   : > { %1008 = vmatpush3.bf16.msra.mxu0 %v1102_v56 }
  0x59   : > { %1009 = vmatprep.subr.bf16.mxu0 %v1228_v0 }
  0x5c   : > { %1010 = vmatpush3.bf16.msra.mxu0 %v1103_v57 }
  0x5d   : > { %1011 = vmatprep.subr.bf16.mxu0 %v1228_v0  ;;  %v934_v0 = vld [vmem:[%s1544_s8] ss:$0 sm:$0xff] }
  0x60   : > { %1012 = vmatpush3.bf16.msra.mxu0 %v1104_v58 }
 0x115   : > { %v493_v6 = vpop.f32.mrb[0].mxu0 }
 0x116   : > { %v506_v7 = vadd.f32 %v921_v5, %v493_v6  ;;  %v975_v8 = vpop.f32.mrb[1].mxu0 }
 0x117   : > { %v496_v9 = vpop.f32.mrb[2].mxu0 }
 0x118   : > { %509 = vadd.xlane.f32.xlu0 %v506_v7  ;;  %v976_v10 = vpop.f32.mrb[3].mxu0 }
 0x1a5   : > { %v510_v11 = vpop.xlane.xlu0 %509 }
 0x1a6   : > { %v511_v12 = vmul.f32 0.03125, %v510_v11 }
 0x1a8   : > { %v512_v13 = vsub.f32 %v506_v7, %v511_v12  ;;  %v516_v23 = vmul.f32 %v511_v12, %v511_v12 }
 0x1aa   : > { %v513_v14 = vmul.f32 %v512_v13, %v512_v13  ;;  %v517_v24 = vmul.f32 96.0, %v516_v23 }
 0x1ac   : > { %514 = vadd.xlane.f32.xlu0 %v513_v14 }
 0x239   : > { %v515_v25 = vpop.xlane.xlu0 %514 }
 0x23a   : > { %v518_v26 = vsub.f32 %v515_v25, %v517_v24 }
 0x23c   : > { %v519_v27 = vmul.f32 0.03125, %v518_v26 }
 0x23e   : > { %v520_v28 = vadd.f32 1e-05, %v519_v27 }
 0x240   : > { %1105 = vrsqrt.f32 %v520_v28 }
 0x24a   : > { %v1106_v29 = vpop.eup %1105 }
 0x24b   : > { %v522_v31 = vmul.f32 %v1106_v29, %v512_v13  ;;  %v935_v13 = vld [vmem:[%s1546_s10] ss:$0 sm:$0xff] }
 0x24d   : > { %v529_v33 = vmul.f32 %v922_v30, %v522_v31 }
 0x24f   : > { %v536_v34 = vadd.f32 %v923_v32, %v529_v33 }
 0x251   : > { %v538_v35 = vmul.f32 0.70710677, %v536_v34  ;;  %v537_v37 = vmul.f32 0.5, %v536_v34 }
 0x253   : > { %1107 = verf.f32 %v538_v35 }
 0x25d   : > { %v1108_v36 = vpop.eup %1107 }
 0x25e   : > { %v540_v38 = vadd.f32 1.0, %v1108_v36 }
 0x260   : > { %v541_v39 = vmul.f32 %v540_v38, %v537_v37 }
 0x262   : > { %v542_v40 = vpack.c.bf16 %v541_v39, %v541_v39 }
 0x264   : > { %994 = vmatmul.mubr.bf16.vlgmr.msra.gmra.mrb[0].mxu1 %v542_v40 }
 0x337   : > { %v648_v42 = vpop.f32.mrb[0].mxu1 }
 0x338   : > { %v649_v43 = vadd.f32 %v924_v41, %v648_v42  ;;  %v995_v44 = vpop.f32.mrb[1].mxu1 }
 0x339   : > { %v651_v45 = vpop.f32.mrb[2].mxu1 }
 0x33a   : > { %656 = vadd.xlane.f32.xlu1 %v649_v43  ;;  %v996_v46 = vpop.f32.mrb[3].mxu1 }
 0x3c7   : > { %v657_v47 = vpop.xlane.xlu1 %656 }
 0x3c8   : > { %v658_v48 = vmul.f32 0.03125, %v657_v47 }
 0x3ca   : > { %v659_v49 = vsub.f32 %v649_v43, %v658_v48  ;;  %v663_v59 = vmul.f32 %v658_v48, %v658_v48 }
 0x3cc   : > { %v660_v50 = vmul.f32 %v659_v49, %v659_v49  ;;  %v664_v60 = vmul.f32 96.0, %v663_v59 }
 0x3ce   : > { %661 = vadd.xlane.f32.xlu1 %v660_v50 }
 0x45b   : > { %v662_v61 = vpop.xlane.xlu1 %661 }
 0x45c   : > { %v665_v62 = vsub.f32 %v662_v61, %v664_v60 }
 0x45e   : > { %v666_v63 = vmul.f32 0.03125, %v665_v62 }
 0x460   : > { %v667_v1 = vadd.f32 1e-05, %v666_v63 }
 0x462   : > { %1109 = vrsqrt.f32 %v667_v1 }
 0x46c   : > { %v1110_v2 = vpop.eup %1109 }
 0x46d   : > { %v669_v4 = vmul.f32 %v1110_v2, %v659_v49 }
 0x46f   : > { %v676_v5 = vmul.f32 %v933_v3, %v669_v4 }
 0x471   : > { %v683_v6 = vadd.f32 %v934_v0, %v676_v5 }
 0x473   : > { %v685_v7 = vmul.f32 0.70710677, %v683_v6  ;;  %v684_v9 = vmul.f32 0.5, %v683_v6 }
 0x475   : > { %1111 = verf.f32 %v685_v7 }
 0x47f   : > { %v1112_v8 = vpop.eup %1111 }
 0x480   : > { %v687_v10 = vadd.f32 1.0, %v1112_v8 }
 0x482   : > { %v688_v11 = vmul.f32 %v687_v10, %v684_v9 }
 0x484   : > { %v689_v12 = vpack.c.bf16 %v688_v11, %v688_v11 }
 0x486   : > { %1014 = vmatmul.mubr.bf16.vlgmr.msra.gmra.mrb[4].mxu0 %v689_v12 }
 0x559   : > { %v795_v14 = vpop.f32.mrb[4].mxu0 }
 0x55a   : > { %v796_v15 = vadd.f32 %v935_v13, %v795_v14  ;;  %v1015_v16 = vpop.f32.mrb[5].mxu0 }
 0x55b   : > { %v798_v17 = vpop.f32.mrb[6].mxu0 }
 0x55c   : > { %v1016_v18 = vpop.f32.mrb[7].mxu0  ;;  %801 = vst.msk [vmem:[%s425_s14] sm:$0xff] %vm455_vm1, %v796_v15 }
 0x55d   : > { %1154 = shalt.err (!%p1151_p6)
}
 0x55e   : > { %s1155_s12 = scalar_lea.hbm %s1488_s23, 128  ;;  %s1159_s14 = scalar_lea.hbm %s1547_s11, 256 }
 0x55f   : > { %p1156_p7 = scmp.ne.s32.totalorder %s1488_s23, %s1155_s12  ;;  %p1160_p0 = scmp.lt.u32.totalorder %s1488_s23, %s1547_s11 }
 0x560   : > { %p1161_p2 = scmp.lt.u32.totalorder %s1159_s14, %s1155_s12  ;;  %p1163_p8 = scmp.lt.u32.totalorder %s1155_s12, %s1488_s23 }
 0x561   : > { %p1157_p9 = pnand %p1156_p7, %p1564_p10 }
 0x562   : > { %p1162_p4 = por %p1161_p2, %p1160_p0 }
 0x563   : > { %p1158_p12 = pneg %p1157_p9 }
 0x564   : > { %p1164_p11 = por %p1163_p8, %p1162_p4 }
 0x566   : > { %p1165_p13 = pnand %p1164_p11, %p1158_p12 }
 0x568   : > { %1168 = shalt.err (!%p1165_p13)
}
 0x569   : > { %1021 = dma.vmem_to_hbm [thread:$0]  (%p1564_p10), %s1490_s25, 128, %s1488_s23, %s803_s20  }
 0x56a PF: > { %p1033_p1 = scmp.ge.s32.totalorder %s1223_s22, 2  ;;  %s829_s21 = sand.u32 1, %s1203_s17  }
 0x56b   : > { %p1565_p3 = scmp.ne.s32.totalorder %s1557_s29, 0  ;;  %s830_s30 = scalar_lea.sflag [#allocation4], %s829_s21 }
 0x56d   : > { %p1028_p5 = pnand %p1033_p1, %p1565_p3 }
 0x56f   : > { %1198 = dma.done.wait (!%p1028_p5), %s830_s30, 128  }
 0x570   : > { %1200 = vsyncadd (!%p1028_p5), %s830_s30, 4294967168  ;;  %s25_s22 = sadd.s32 1, %s1223_s22   ;;  %s1566_s27 = sld [smem:[#allocation10_spill]] }
 0x571   : > { %p22_p6 = scmp.ge.s32.totalorder %s25_s22, 4   ;;  %s1567_s20 = sld [smem:[#allocation8_spill]] }
 0x572   : > { %s1568_s21 = sld [smem:[#allocation9_spill]]  ;;  %s1569_s17 = smov %s1207_s18 }
 0x573   : > { %s1570_s18 = smov %s1211_s19  ;;  %24 = sbr.rel (!%p22_p6) target bundleno = 5 (0x5), region = 107 }
 0x576   : > { %s1571_s19 = smov %s1566_s27 }
 0x57a   :  { %835 = vsyncpa [#allocation3], 1 }
 0x57b   :  { %837 = vsyncpa [#allocation3 + $0x1], 1 }
 0x57c   :  { %838 = vsyncpa [#allocation4], 1 }
 0x57d   :  { %840 = vsyncpa [#allocation4 + $0x1], 1 }

// kernel: tpu_custom_call.1
= control target key start
LH: loop header
LB: loop body
LE: loop exit
PB: predicated region body
PF: predicated region fallthrough
CT: control target
= control target key end

     0   :  { %16 = vsyncpa [#allocation3], 0  ;;  %s1536_s0 = inlined_call_operand.vmem [shape: f32[2,8,32], index: 0, kind: input, shape index: {}]   ;;  %s1537_s1 = inlined_call_operand.vmem [shape: f32[2,1,128], index: 1, kind: input, shape index: {}]   ;;  %s1538_s2 = inlined_call_operand.hbm [shape: bf16[32,128], index: 2, kind: input, shape index: {}]   ;;  %s1539_s3 = inlined_call_operand.vmem [shape: f32[1,128], index: 3, kind: input, shape index: {}]   ;;  %s1540_s4 = inlined_call_operand.vmem [shape: f32[1,128], index: 4, kind: input, shape index: {}]   ;;  %s1541_s5 = inlined_call_operand.vmem [shape: bf16[128,128], index: 5, kind: input, shape index: {}]   ;;  %s1542_s6 = inlined_call_operand.vmem [shape: f32[1,128], index: 6, kind: input, shape index: {}]   ;;  %s1543_s7 = inlined_call_operand.vmem [shape: f32[1,128], index: 7, kind: input, shape index: {}]   ;;  %s1544_s8 = inlined_call_operand.vmem [shape: f32[1,128], index: 8, kind: input, shape index: {}]   ;;  %s1545_s9 = inlined_call_operand.vmem [shape: bf16[128,32], index: 9, kind: input, shape index: {}]   ;;  %s1546_s10 = inlined_call_operand.vmem [shape: f32[1,32], index: 10, kind: input, shape index: {}]   ;;  %s1547_s11 = inlined_call_operand.hbm [shape: f32[2,8,32], index: 11, kind: output, shape index: {}]  }
   0x1   :  { %17 = vsyncpa [#allocation4], 0 }
   0x2   :  { %19 = vsyncpa [#allocation4 + $0x1], 0  ;;  %s1291_s17 = smov 0   ;;  %s1293_s18 = smov 0  }
   0x3   :  { %s1295_s19 = smov 0   ;;  %s1297_s20 = smov 0  }
   0x4   :  { %s1299_s21 = smov 0   ;;  %s1301_s22 = smov 0  }
   0x5 LB: > { %1554 = sst [smem:[#allocation8_spill]] %s1219_s21  ;;  %s909_s23 = sadd.s32 4294967295, %s1223_s22   ;;  %s1223_s22 = sphi %s1301_s22, %s25_s22   ;;  %s1219_s21 = sphi %s1299_s21, %s1568_s21   ;;  %s1215_s20 = sphi %s1297_s20, %s1567_s20   ;;  %s1211_s19 = sphi %s1295_s19, %s1571_s19   ;;  %s1207_s18 = sphi %s1293_s18, %s1570_s18   ;;  %s1203_s17 = sphi %s1291_s17, %s1569_s17  }
   0x6   : > { %s910_s24 = sadd.s32 4294967294, %s1223_s22   ;;  %s37_s25 = sadd.s32 1, %s1219_s21 }
   0x7   : > { %s289_s26 = sadd.s32 1, %s1211_s19  ;;  %p39_p0 = scmp.ge.s32.totalorder %s37_s25, 2 }
   0x8   : > { %p299_p1 = scmp.ne.s32.totalorder %s1211_s19, %s1207_s18  ;;  %p300_p2 = scmp.eq.s32.totalorder %s909_s23, 1 }
   0x9   : > { %p305_p3 = scmp.ne.s32.totalorder %s1207_s18, %s1203_s17  ;;  %s1573_s25 = smov (%p39_p0, %s37_s25), 0 }
   0xa   : > { %1555 = sst [smem:[#allocation9_spill]] %s1573_s25  ;;  %p1331_p4 = por %p300_p2, %p299_p1 }
   0xb   : > { %p306_p5 = scmp.eq.s32.totalorder %s910_s24, 1  ;;  %s284_s28 = ssub.s32 %s1219_s21, %s1573_s25 }
   0xc   : > { %s1556_s27 = scalar_select %p1331_p4, 1, 0 }
   0xd   : > { %p911_p6 = scmp.ge.s32.totalorder %s1223_s22, 1  ;;  %p287_p7 = scmp.eq.s32.totalorder %s284_s28, 0 }
   0xe   : > { %p1338_p8 = por %p306_p5, %p305_p3  ;;  %p313_p9 = scmp.lt.s32.totalorder %s1223_s22, 3 }
   0xf   : > { %s1344_s30 = scalar_select %p287_p7, %s1211_s19, %s289_s26  }
  0x10   : > { %s1557_s29 = scalar_select %p1338_p8, 1, 0 }
  0x11   : > { %1558 = sst [smem:[#allocation10_spill]] %s1344_s30  ;;  %p1346_p10 = pnand %p911_p6, %p313_p9 }
  0x12   : > { %p1350_p11 = scmp.eq.s32.totalorder %s909_s23, 0  ;;  %s1225_s14 = smov [#allocation2]  }
  0x13   : > { %s1559_s12 = scalar_select %p1346_p10, 1, 0 }
  0x14   : > { %s1560_s13 = scalar_select %p1350_p11, 1, 0 }
  0x15   : > { %p1023_p12 = pneg %p1346_p10  ;;  %s325_s15 = sshll.u32 %s1225_s14, 4  ;;  %s326_s15 = int_to_ptr.vmem [resolvable:$true] %s325_s15 }
  0x16   : > { %s1113_s28 = scalar_lea.hbm %s1538_s2, 256 }
  0x17   : > { %p1358_p13 = pnand %p1350_p11, %p1023_p12  ;;  %p1114_p0 = scmp.ne.s32.totalorder %s1538_s2, %s1113_s28 }
  0x18   : > { %p1120_p5 = scmp.lt.u32.totalorder %s1113_s28, %s1538_s2 }
  0x19   : > { %p1115_p1 = pneg %p1358_p13 }
  0x1b   : > { %p1116_p2 = pnand %p1115_p1, %p1114_p0 }
  0x1d   : > { %p1117_p3 = pneg %p1116_p2 }
  0x1f   : > { %p1122_p6 = pnand %p1120_p5, %p1117_p3 }
  0x21   : > { %1125 = shalt.err (!%p1122_p6)
}
  0x22   : > { %s1126_s30 = scalar_lea.vmem %s326_s15, 256  ;;  %p1134_p8 = scmp.lt.s32.totalorder %s326_s15, %s326_s15 }
  0x23   : > { %p1127_p7 = scmp.ne.s32.totalorder %s326_s15, %s1126_s30  ;;  %p1135_p4 = scmp.lt.s32.totalorder %s1126_s30, %s1126_s30 }
  0x25   : > { %p1129_p9 = pnand %p1127_p7, %p1115_p1  ;;  %p1136_p11 = por %p1135_p4, %p1134_p8 }
  0x27   : > { %p1130_p12 = pneg %p1129_p9 }
  0x29   : > { %p1137_p10 = pnand %p1136_p11, %p1130_p12 }
  0x2b   : > { %1140 = shalt.err (!%p1137_p10)
}
  0x2c   : > { %s1226_s25 = smov 64   ;;  %s1227_s24 = smov 4  }
  0x2d   : > { %1026 = dma.hbm_to_vmem [thread:$0]  (!%p1358_p13), %s1538_s2, 256, %s326_s15, [#allocation3], %s1226_s25, %s1226_s25, %s1227_s24  }
  0x2e   : > { %p1562_p0 = scmp.ne.s32.totalorder %s1559_s12, 0 }
  0x2f   : > { %p1563_p2 = scmp.ne.s32.totalorder (!%p1562_p0), %s1560_s13, 0 }
  0x30   : > { %381 = sbr.rel (%p1562_p0) target bundleno = 1386 (0x56a), region = 64 }
  0x37   : > { %1194 = dma.done.wait (%p1563_p2), [#allocation3], 256  }
  0x38   : > { %1196 = vsyncadd (%p1563_p2), [#allocation3], 4294967040  ;;  %p426_p4 = scmp.lt.s32.totalorder %s1215_s20, 1  ;;  %v1228_v0 = vmov 0.0   ;;  %vm1229_vm0 = vmmov 0   ;;  %v1087_v1 = vld [vmem:[#allocation2] sm:$0xff]  }
  0x39   : > { %969 = vmatprep.subr.bf16.mxu0 %v1228_v0  ;;  %973 = vmatprep.mubr.msk.bf16.mxu0 %vm1229_vm0, %v1228_v0  ;;  %v1088_v2 = vld [vmem:[#allocation2 + $0x8] sm:$0xff]   ;;  %vm455_vm1 = vcmask 261120   ;;  %v1089_v15 = vld [vmem:[%s1541_s5] sm:$0xff]   ;;  %v1091_v17 = vld [vmem:[%s1541_s5 + $0x10] sm:$0xff]   ;;  %s423_s12 = sand.u32 1, %s1207_s18   ;;  %s945_s28 = sshll.u32 %s1215_s20, 7 }
  0x3a   : > { %s427_s21 = scalar_select %p426_p4, %s1215_s20, 1  ;;  %977 = vmatprep.subr.bf16.mxu1 %v1228_v0  ;;  %993 = vmatprep.mubr.msk.bf16.mxu1 %vm1229_vm0, %v1228_v0  ;;  %v1090_v16 = vld [vmem:[%s1541_s5 + $0x8] sm:$0xff]   ;;  %v1092_v18 = vld [vmem:[%s1541_s5 + $0x18] sm:$0xff]   ;;  %v1093_v19 = vld [vmem:[%s1541_s5 + $0x20] sm:$0xff]  }
  0x3b   : > { %970 = vmatpush3.bf16.msra.mxu0 %v1087_v1  ;;  %978 = vmatpush3.bf16.msra.mxu1 %v1089_v15  ;;  %v1094_v20 = vld [vmem:[%s1541_s5 + $0x28] sm:$0xff]   ;;  %v1095_v21 = vld [vmem:[%s1541_s5 + $0x30] sm:$0xff]   ;;  %v1096_v22 = vld [vmem:[%s1541_s5 + $0x38] sm:$0xff]   ;;  %s916_s13 = sshll.u32 %s423_s12, 3  ;;  %s1488_s23 = scalar_lea.hbm %s1547_s11, %s945_s28 }
  0x3c   : > { %s917_s30 = sshll.u32 %s427_s21, 3  ;;  %971 = vmatprep.subr.bf16.mxu0 %v1228_v0  ;;  %s435_s14 = scalar_lea.vmem %s1537_s1, %s427_s21  ;;  %979 = vmatprep.subr.bf16.mxu1 %v1228_v0  ;;  %v922_v30 = vld [vmem:[%s1539_s3] ss:$0 sm:$0xff]  ;;  %v1098_v52 = vld [vmem:[%s1545_s9 + $0x8] sm:$0xff]   ;;  %v1099_v53 = vld [vmem:[%s1545_s9 + $0x10] sm:$0xff]  }
  0x3d   : > { %s432_s15 = scalar_lea.vmem %s1536_s0, %s917_s30  ;;  %v921_v5 = vld [vmem:[%s435_s14] ss:$0 sm:$0xff]  ;;  %v1100_v54 = vld [vmem:[%s1545_s9 + $0x18] sm:$0xff]   ;;  %v1102_v56 = vld [vmem:[%s1545_s9 + $0x28] sm:$0xff]   ;;  %s425_s14 = scalar_lea.vmem [#allocation5], %s916_s13 }
  0x3e   : > { %v437_v3 = vld [vmem:[%s432_s15] sm:$0xff]  ;;  %v1103_v57 = vld [vmem:[%s1545_s9 + $0x30] sm:$0xff]   ;;  %v1104_v58 = vld [vmem:[%s1545_s9 + $0x38] sm:$0xff]   ;;  %s817_s25 = sshll.u32 %s425_s14, 4  ;;  %s803_s20 = scalar_lea.sflag [#allocation4], %s423_s12  ;;  %s1490_s25 = int_to_ptr.vmem [resolvable:$true] %s817_s25 }
  0x3f   : > { %v438_v4 = vpack.c.bf16 %v437_v3, %v437_v3  ;;  %972 = vmatpush3.bf16.msra.mxu0 %v1088_v2  ;;  %980 = vmatpush3.bf16.msra.mxu1 %v1090_v16  ;;  %v923_v32 = vld [vmem:[%s1540_s4] ss:$0 sm:$0xff]  ;;  %s1141_s21 = scalar_lea.vmem %s1490_s25, 128  ;;  %p1564_p10 = scmp.ne.s32.totalorder %s1556_s27, 0 }
  0x40   : > { %997 = vmatprep.subr.bf16.mxu0 %v1228_v0  ;;  %981 = vmatprep.subr.bf16.mxu1 %v1228_v0  ;;  %v924_v41 = vld [vmem:[%s1542_s6] ss:$0 sm:$0xff]  ;;  %p1142_p8 = scmp.ne.s32.totalorder %s1490_s25, %s1141_s21  ;;  %s1230_s30 = smov [#allocation5]  }
  0x41   : > { %v1097_v51 = vld [vmem:[%s1545_s9] sm:$0xff]   ;;  %s1145_s13 = sshll.u32 %s1230_s30, 4  ;;  %s1146_s13 = int_to_ptr.vmem [resolvable:$false] %s1145_s13 }
  0x42   : > { %974 = vmatmul.mubr.msk.bf16.vlgmr.msra.gmra.mrb[0].mxu0 %vm455_vm1, %v438_v4  ;;  %v1101_v55 = vld [vmem:[%s1545_s9 + $0x20] sm:$0xff]   ;;  %p1143_p11 = pnand %p1142_p8, %p1564_p10  ;;  %s1147_s15 = scalar_lea.vmem %s1146_s13, 256 }
  0x43   : > { %1013 = vmatprep.mubr.msk.bf16.mxu0 %vm1229_vm0, %v1228_v0  ;;  %982 = vmatpush3.bf16.msra.mxu1 %v1091_v17  ;;  %v933_v3 = vld [vmem:[%s1543_s7] ss:$0 sm:$0xff]  ;;  %p1148_p1 = scmp.lt.s32.totalorder %s1490_s25, %s1146_s13  ;;  %p1149_p3 = scmp.lt.s32.totalorder %s1147_s15, %s1141_s21 }
  0x44   : > { %983 = vmatprep.subr.bf16.mxu1 %v1228_v0  ;;  %998 = vmatpush3.bf16.msra.mxu0 %v1097_v51  ;;  %p1144_p13 = pneg %p1143_p11 }
  0x45   : > { %999 = vmatprep.subr.bf16.mxu0 %v1228_v0  ;;  %p1150_p5 = por %p1149_p3, %p1148_p1 }
  0x47   : > { %984 = vmatpush3.bf16.msra.mxu1 %v1092_v18  ;;  %p1151_p6 = pnand %p1150_p5, %p1144_p13 }
  0x48   : > { %985 = vmatprep.subr.bf16.mxu1 %v1228_v0  ;;  %1000 = vmatpush3.bf16.msra.mxu0 %v1098_v52 }
  0x49   : > { %1001 = vmatprep.subr.bf16.mxu0 %v1228_v0 }
  0x4b   : > { %986 = vmatpush3.bf16.msra.mxu1 %v1093_v19 }
  0x4c   : > { %987 = vmatprep.subr.bf16.mxu1 %v1228_v0  ;;  %1002 = vmatpush3.bf16.msra.mxu0 %v1099_v53 }
  0x4d   : > { %1003 = vmatprep.subr.bf16.mxu0 %v1228_v0 }
  0x4f   : > { %988 = vmatpush3.bf16.msra.mxu1 %v1094_v20 }
  0x50   : > { %989 = vmatprep.subr.bf16.mxu1 %v1228_v0  ;;  %1004 = vmatpush3.bf16.msra.mxu0 %v1100_v54 }
  0x51   : > { %1005 = vmatprep.subr.bf16.mxu0 %v1228_v0 }
  0x53   : > { %990 = vmatpush3.bf16.msra.mxu1 %v1095_v21 }
  0x54   : > { %991 = vmatprep.subr.bf16.mxu1 %v1228_v0  ;;  %1006 = vmatpush3.bf16.msra.mxu0 %v1101_v55 }
  0x55   : > { %1007 = vmatprep.subr.bf16.mxu0 %v1228_v0 }
  0x57   : > { %992 = vmatpush3.bf16.msra.mxu1 %v1096_v22 }
  0x58   : > { %1008 = vmatpush3.bf16.msra.mxu0 %v1102_v56 }
  0x59   : > { %1009 = vmatprep.subr.bf16.mxu0 %v1228_v0 }
  0x5c   : > { %1010 = vmatpush3.bf16.msra.mxu0 %v1103_v57 }
  0x5d   : > { %1011 = vmatprep.subr.bf16.mxu0 %v1228_v0  ;;  %v934_v0 = vld [vmem:[%s1544_s8] ss:$0 sm:$0xff] }
  0x60   : > { %1012 = vmatpush3.bf16.msra.mxu0 %v1104_v58 }
 0x115   : > { %v493_v6 = vpop.f32.mrb[0].mxu0 }
 0x116   : > { %v506_v7 = vadd.f32 %v921_v5, %v493_v6  ;;  %v975_v8 = vpop.f32.mrb[1].mxu0 }
 0x117   : > { %v496_v9 = vpop.f32.mrb[2].mxu0 }
 0x118   : > { %509 = vadd.xlane.f32.xlu0 %v506_v7  ;;  %v976_v10 = vpop.f32.mrb[3].mxu0 }
 0x1a5   : > { %v510_v11 = vpop.xlane.xlu0 %509 }
 0x1a6   : > { %v511_v12 = vmul.f32 0.03125, %v510_v11 }
 0x1a8   : > { %v512_v13 = vsub.f32 %v506_v7, %v511_v12  ;;  %v516_v23 = vmul.f32 %v511_v12, %v511_v12 }
 0x1aa   : > { %v513_v14 = vmul.f32 %v512_v13, %v512_v13  ;;  %v517_v24 = vmul.f32 96.0, %v516_v23 }
 0x1ac   : > { %514 = vadd.xlane.f32.xlu0 %v513_v14 }
 0x239   : > { %v515_v25 = vpop.xlane.xlu0 %514 }
 0x23a   : > { %v518_v26 = vsub.f32 %v515_v25, %v517_v24 }
 0x23c   : > { %v519_v27 = vmul.f32 0.03125, %v518_v26 }
 0x23e   : > { %v520_v28 = vadd.f32 1e-05, %v519_v27 }
 0x240   : > { %1105 = vrsqrt.f32 %v520_v28 }
 0x24a   : > { %v1106_v29 = vpop.eup %1105 }
 0x24b   : > { %v522_v31 = vmul.f32 %v1106_v29, %v512_v13  ;;  %v935_v13 = vld [vmem:[%s1546_s10] ss:$0 sm:$0xff] }
 0x24d   : > { %v529_v33 = vmul.f32 %v922_v30, %v522_v31 }
 0x24f   : > { %v536_v34 = vadd.f32 %v923_v32, %v529_v33 }
 0x251   : > { %v538_v35 = vmul.f32 0.70710677, %v536_v34  ;;  %v537_v37 = vmul.f32 0.5, %v536_v34 }
 0x253   : > { %1107 = verf.f32 %v538_v35 }
 0x25d   : > { %v1108_v36 = vpop.eup %1107 }
 0x25e   : > { %v540_v38 = vadd.f32 1.0, %v1108_v36 }
 0x260   : > { %v541_v39 = vmul.f32 %v540_v38, %v537_v37 }
 0x262   : > { %v542_v40 = vpack.c.bf16 %v541_v39, %v541_v39 }
 0x264   : > { %994 = vmatmul.mubr.bf16.vlgmr.msra.gmra.mrb[0].mxu1 %v542_v40 }
 0x337   : > { %v648_v42 = vpop.f32.mrb[0].mxu1 }
 0x338   : > { %v649_v43 = vadd.f32 %v924_v41, %v648_v42  ;;  %v995_v44 = vpop.f32.mrb[1].mxu1 }
 0x339   : > { %v651_v45 = vpop.f32.mrb[2].mxu1 }
 0x33a   : > { %656 = vadd.xlane.f32.xlu1 %v649_v43  ;;  %v996_v46 = vpop.f32.mrb[3].mxu1 }
 0x3c7   : > { %v657_v47 = vpop.xlane.xlu1 %656 }
 0x3c8   : > { %v658_v48 = vmul.f32 0.03125, %v657_v47 }
 0x3ca   : > { %v659_v49 = vsub.f32 %v649_v43, %v658_v48  ;;  %v663_v59 = vmul.f32 %v658_v48, %v658_v48 }
 0x3cc   : > { %v660_v50 = vmul.f32 %v659_v49, %v659_v49  ;;  %v664_v60 = vmul.f32 96.0, %v663_v59 }
 0x3ce   : > { %661 = vadd.xlane.f32.xlu1 %v660_v50 }
 0x45b   : > { %v662_v61 = vpop.xlane.xlu1 %661 }
 0x45c   : > { %v665_v62 = vsub.f32 %v662_v61, %v664_v60 }
 0x45e   : > { %v666_v63 = vmul.f32 0.03125, %v665_v62 }
 0x460   : > { %v667_v1 = vadd.f32 1e-05, %v666_v63 }
 0x462   : > { %1109 = vrsqrt.f32 %v667_v1 }
 0x46c   : > { %v1110_v2 = vpop.eup %1109 }
 0x46d   : > { %v669_v4 = vmul.f32 %v1110_v2, %v659_v49 }
 0x46f   : > { %v676_v5 = vmul.f32 %v933_v3, %v669_v4 }
 0x471   : > { %v683_v6 = vadd.f32 %v934_v0, %v676_v5 }
 0x473   : > { %v685_v7 = vmul.f32 0.70710677, %v683_v6  ;;  %v684_v9 = vmul.f32 0.5, %v683_v6 }
 0x475   : > { %1111 = verf.f32 %v685_v7 }
 0x47f   : > { %v1112_v8 = vpop.eup %1111 }
 0x480   : > { %v687_v10 = vadd.f32 1.0, %v1112_v8 }
 0x482   : > { %v688_v11 = vmul.f32 %v687_v10, %v684_v9 }
 0x484   : > { %v689_v12 = vpack.c.bf16 %v688_v11, %v688_v11 }
 0x486   : > { %1014 = vmatmul.mubr.bf16.vlgmr.msra.gmra.mrb[4].mxu0 %v689_v12 }
 0x559   : > { %v795_v14 = vpop.f32.mrb[4].mxu0 }
 0x55a   : > { %v796_v15 = vadd.f32 %v935_v13, %v795_v14  ;;  %v1015_v16 = vpop.f32.mrb[5].mxu0 }
 0x55b   : > { %v798_v17 = vpop.f32.mrb[6].mxu0 }
 0x55c   : > { %v1016_v18 = vpop.f32.mrb[7].mxu0  ;;  %801 = vst.msk [vmem:[%s425_s14] sm:$0xff] %vm455_vm1, %v796_v15 }
 0x55d   : > { %1154 = shalt.err (!%p1151_p6)
}
 0x55e   : > { %s1155_s12 = scalar_lea.hbm %s1488_s23, 128  ;;  %s1159_s14 = scalar_lea.hbm %s1547_s11, 256 }
 0x55f   : > { %p1156_p7 = scmp.ne.s32.totalorder %s1488_s23, %s1155_s12  ;;  %p1160_p0 = scmp.lt.u32.totalorder %s1488_s23, %s1547_s11 }
 0x560   : > { %p1161_p2 = scmp.lt.u32.totalorder %s1159_s14, %s1155_s12  ;;  %p1163_p8 = scmp.lt.u32.totalorder %s1155_s12, %s1488_s23 }
 0x561   : > { %p1157_p9 = pnand %p1156_p7, %p1564_p10 }
 0x562   : > { %p1162_p4 = por %p1161_p2, %p1160_p0 }
 0x563   : > { %p1158_p12 = pneg %p1157_p9 }
 0x564   : > { %p1164_p11 = por %p1163_p8, %p1162_p4 }
 0x566   : > { %p1165_p13 = pnand %p1164_p11, %p1158_p12 }
 0x568   : > { %1168 = shalt.err (!%p1165_p13)
}
 0x569   : > { %1021 = dma.vmem_to_hbm [thread:$0]  (%p1564_p10), %s1490_s25, 128, %s1488_s23, %s803_s20  }
 0x56a PF: > { %p1033_p1 = scmp.ge.s32.totalorder %s1223_s22, 2  ;;  %s829_s21 = sand.u32 1, %s1203_s17  }
 0x56b   : > { %p1565_p3 = scmp.ne.s32.totalorder %s1557_s29, 0  ;;  %s830_s30 = scalar_lea.sflag [#allocation4], %s829_s21 }
 0x56d   : > { %p1028_p5 = pnand %p1033_p1, %p1565_p3 }
 0x56f   : > { %1198 = dma.done.wait (!%p1028_p5), %s830_s30, 128  }
 0x570   : > { %1200 = vsyncadd (!%p1028_p5), %s830_s30, 4294967168  ;;  %s25_s22 = sadd.s32 1, %s1223_s22   ;;  %s1566_s27 = sld [smem:[#allocation10_spill]] }
 0x571   : > { %p22_p6 = scmp.ge.s32.totalorder %s25_s22, 4   ;;  %s1567_s20 = sld [smem:[#allocation8_spill]] }
 0x572   : > { %s1568_s21 = sld [smem:[#allocation9_spill]]  ;;  %s1569_s17 = smov %s1207_s18 }
 0x573   : > { %s1570_s18 = smov %s1211_s19  ;;  %24 = sbr.rel (!%p22_p6) target bundleno = 5 (0x5), region = 107 }
 0x576   : > { %s1571_s19 = smov %s1566_s27 }
 0x57a   :  { %835 = vsyncpa [#allocation3], 1 }
 0x57b   :  { %837 = vsyncpa [#allocation3 + $0x1], 1 }
 0x57c   :  { %838 = vsyncpa [#allocation4], 1 }
 0x57d   :  { %840 = vsyncpa [#allocation4 + $0x1], 1 }

</bundles_post_ra>
